<compile_context>
chip_gen: v5e
topology: v5e:2x2
jax: 0.10.0
libtpu: 0.0.40
codegen_flags: <defaults>
</compile_context>

<pallas_src>
import jax
import jax.numpy as jnp
from jax.experimental import pallas as pl
from jax.experimental.pallas import tpu as pltpu


def _make_conv3x3_kernel(Cin, Cout, H, W):
    HW = H * W

    def kernel(x_ref, w_ref, b_ref, o_ref):
        # x_ref: (1, Cin, HW + 2*W + 2)  VMEM  flattened + zero-padded image (lane-dense)
        # w_ref: (Cout, Cin * 9)         SMEM  OIHW weights, flattened per out-channel
        # b_ref: (Cout,)                 SMEM  bias
        # o_ref: (1, Cout, HW)           VMEM  full-frame output (wrapper crops to Ho x Wo)
        accs = [jnp.zeros((HW,), jnp.float32) for _ in range(Cout)]
        for kh in range(3):
            for kw in range(3):
                s = kh * W + kw                       # static tap shift in flat space
                for ci in range(Cin):
                    # Offset load of the shifted window directly from the ref.
                    win = x_ref[0, ci, pl.ds(s, HW)]  # (HW,) -- 256 lanes, lane-dense
                    idx = ci * 9 + kh * 3 + kw
                    for co in range(Cout):
                        # scalar (SMEM) * vector broadcast-FMA on the VPU
                        accs[co] = accs[co] + win * w_ref[co, idx]
        for co in range(Cout):
            o_ref[0, co, :] = (accs[co] + b_ref[co]).astype(o_ref.dtype)

    return kernel


def suppression_forward(x_nchw, w_oihw, bias):
    """3x3 valid conv + bias, NCHW in / NCHW out.

    x_nchw: (N, Cin, H, W);  w_oihw: (Cout, Cin, 3, 3) (PyTorch layout);  bias: (Cout,).
    Returns (N, Cout, H-2, W-2).
    """
    N, Cin, H, W = x_nchw.shape
    Cout, _, KH, KW = w_oihw.shape
    assert (KH, KW) == (3, 3)
    Ho, Wo = H - 2, W - 2
    HW = H * W
    PAD = 2 * W + 2                       # max tap shift; keeps all in-kernel reads in bounds
    HWP = HW + PAD

    # Flatten the spatial plane onto the lane axis (free reshape, no transpose) and
    # zero-pad the tail so every shifted 3x3 tap is an in-bounds offset read.
    x_flat = x_nchw.reshape(N, Cin, HW)
    x_pad = jnp.pad(x_flat, ((0, 0), (0, 0), (0, PAD)))

    # Pre-flatten params once into their kernel (SMEM scalar-table) layout.
    w_flat = w_oihw.reshape(Cout, Cin * 9).astype(jnp.float32)
    b_flat = bias.astype(jnp.float32)

    kernel = _make_conv3x3_kernel(Cin, Cout, H, W)

    out_frame = pl.pallas_call(
        kernel,
        out_shape=jax.ShapeDtypeStruct((N, Cout, HW), x_nchw.dtype),
        grid=(N,),
        in_specs=[
            pl.BlockSpec((1, Cin, HWP), lambda n: (n, 0, 0)),
            pl.BlockSpec(memory_space=pltpu.MemorySpace.SMEM),   # weights as SMEM scalars
            pl.BlockSpec(memory_space=pltpu.MemorySpace.SMEM),   # bias as SMEM scalars
        ],
        out_specs=pl.BlockSpec((1, Cout, HW), lambda n: (n, 0, 0)),
        compiler_params=pltpu.CompilerParams(
            dimension_semantics=("parallel",)),   # batch axis -> both TCs on v7x
    )(x_pad, w_flat, b_flat)

    # Crop the valid conv window (cheap slice; stays NCHW; positions outside the
    # valid window only ever saw finite zero-padded partial sums).
    # TODO(synk): for large H/W/Cin deployments, halo-tile H inside the kernel and set
    # vmem_limit_bytes explicitly for v7x's 64 MiB VMEM; switch to an MXU im2col matmul
    # (bf16 operands, f32 accumulator) once Cin/Cout reach ~128.
    return out_frame.reshape(N, Cout, H, W)[:, :, :Ho, :Wo]


if __name__ == "__main__":
    key = jax.random.PRNGKey(0)
    k_x, k_w, k_b = jax.random.split(key, 3)

    # Small shapes consistent with the module: batch=2, in_nc=4, out_nc=4, 16x16 spatial.
    N, Cin, Cout, H, W = 2, 4, 4, 16, 16

    x = jax.random.normal(k_x, (N, Cin, H, W), dtype=jnp.float32)

    # Deterministic synthetic parameters (PyTorch Conv2d weight layout OIHW).
    w_oihw = jax.random.normal(k_w, (Cout, Cin, 3, 3), dtype=jnp.float32) * 0.1
    bias = jax.random.normal(k_b, (Cout,), dtype=jnp.float32) * 0.1

    out = suppression_forward(x, w_oihw, bias)
    out = jax.block_until_ready(out)

    # Reference check against XLA's conv (NCHW, OIHW, valid padding).
    ref = jax.lax.conv_general_dilated(
        x, w_oihw, window_strides=(1, 1), padding="VALID",
        dimension_numbers=("NCHW", "OIHW", "NCHW"),
    ) + bias[None, :, None, None]

    assert out.shape == (N, Cout, H - 2, W - 2)
    assert jnp.allclose(out, ref, atol=1e-4, rtol=1e-4)

    print("KERNEL_OK")
</pallas_src>

<mosaic_0001>
module attributes {stable_mosaic.version = 11 : i64} {
  func.func @kernel(%arg0: i32, %arg1: memref<1x4x290xf32, #tpu.memory_space<vmem>>, %arg2: memref<4x36xf32, #tpu.memory_space<smem>>, %arg3: memref<4xf32, #tpu.memory_space<smem>>, %arg4: memref<1x4x256xf32, #tpu.memory_space<vmem>>) attributes {dimension_semantics = [#tpu.dimension_semantics<parallel>], iteration_bounds = array<i64: 2>, scalar_prefetch = 0 : i64, scratch_operands = 0 : i64, tpu.core_type = #tpu.core_type<tc>, window_params = [{transform_indices = @transform_0, window_bounds = array<i64: 1, 4, 290>}, {transform_indices = @transform_1, window_bounds = array<i64: 4, 36>}, {transform_indices = @transform_2, window_bounds = array<i64: 4>}, {transform_indices = @transform_3, window_bounds = array<i64: 1, 4, 256>}]} {
    %cst = arith.constant 0.000000e+00 : f32
    %0 = vector.broadcast %cst : f32 to vector<256xf32>
    %cst_0 = arith.constant 0.000000e+00 : f32
    %1 = vector.broadcast %cst_0 : f32 to vector<256xf32>
    %cst_1 = arith.constant 0.000000e+00 : f32
    %2 = vector.broadcast %cst_1 : f32 to vector<256xf32>
    %cst_2 = arith.constant 0.000000e+00 : f32
    %3 = vector.broadcast %cst_2 : f32 to vector<256xf32>
    %c0 = arith.constant 0 : index
    %c0_3 = arith.constant 0 : index
    %c0_4 = arith.constant 0 : index
    %4 = vector.load %arg1[%c0, %c0_3, %c0_4] : memref<1x4x290xf32, #tpu.memory_space<vmem>>, vector<1x1x256xf32>
    %5 = vector.shape_cast %4 : vector<1x1x256xf32> to vector<256xf32>
    %c0_5 = arith.constant 0 : index
    %c0_6 = arith.constant 0 : index
    %6 = memref.load %arg2[%c0_5, %c0_6] : memref<4x36xf32, #tpu.memory_space<smem>>
    %7 = vector.broadcast %6 : f32 to vector<256xf32>
    %8 = arith.mulf %5, %7 : vector<256xf32>
    %9 = arith.addf %0, %8 : vector<256xf32>
    %c1 = arith.constant 1 : index
    %c0_7 = arith.constant 0 : index
    %10 = memref.load %arg2[%c1, %c0_7] : memref<4x36xf32, #tpu.memory_space<smem>>
    %11 = vector.broadcast %10 : f32 to vector<256xf32>
    %12 = arith.mulf %5, %11 : vector<256xf32>
    %13 = arith.addf %1, %12 : vector<256xf32>
    %c2 = arith.constant 2 : index
    %c0_8 = arith.constant 0 : index
    %14 = memref.load %arg2[%c2, %c0_8] : memref<4x36xf32, #tpu.memory_space<smem>>
    %15 = vector.broadcast %14 : f32 to vector<256xf32>
    %16 = arith.mulf %5, %15 : vector<256xf32>
    %17 = arith.addf %2, %16 : vector<256xf32>
    %c3 = arith.constant 3 : index
    %c0_9 = arith.constant 0 : index
    %18 = memref.load %arg2[%c3, %c0_9] : memref<4x36xf32, #tpu.memory_space<smem>>
    %19 = vector.broadcast %18 : f32 to vector<256xf32>
    %20 = arith.mulf %5, %19 : vector<256xf32>
    %21 = arith.addf %3, %20 : vector<256xf32>
    %c0_10 = arith.constant 0 : index
    %c1_11 = arith.constant 1 : index
    %c0_12 = arith.constant 0 : index
    %22 = vector.load %arg1[%c0_10, %c1_11, %c0_12] : memref<1x4x290xf32, #tpu.memory_space<vmem>>, vector<1x1x256xf32>
    %23 = vector.shape_cast %22 : vector<1x1x256xf32> to vector<256xf32>
    %c0_13 = arith.constant 0 : index
    %c9 = arith.constant 9 : index
    %24 = memref.load %arg2[%c0_13, %c9] : memref<4x36xf32, #tpu.memory_space<smem>>
    %25 = vector.broadcast %24 : f32 to vector<256xf32>
    %26 = arith.mulf %23, %25 : vector<256xf32>
    %27 = arith.addf %9, %26 : vector<256xf32>
    %c1_14 = arith.constant 1 : index
    %c9_15 = arith.constant 9 : index
    %28 = memref.load %arg2[%c1_14, %c9_15] : memref<4x36xf32, #tpu.memory_space<smem>>
    %29 = vector.broadcast %28 : f32 to vector<256xf32>
    %30 = arith.mulf %23, %29 : vector<256xf32>
    %31 = arith.addf %13, %30 : vector<256xf32>
    %c2_16 = arith.constant 2 : index
    %c9_17 = arith.constant 9 : index
    %32 = memref.load %arg2[%c2_16, %c9_17] : memref<4x36xf32, #tpu.memory_space<smem>>
    %33 = vector.broadcast %32 : f32 to vector<256xf32>
    %34 = arith.mulf %23, %33 : vector<256xf32>
    %35 = arith.addf %17, %34 : vector<256xf32>
    %c3_18 = arith.constant 3 : index
    %c9_19 = arith.constant 9 : index
    %36 = memref.load %arg2[%c3_18, %c9_19] : memref<4x36xf32, #tpu.memory_space<smem>>
    %37 = vector.broadcast %36 : f32 to vector<256xf32>
    %38 = arith.mulf %23, %37 : vector<256xf32>
    %39 = arith.addf %21, %38 : vector<256xf32>
    %c0_20 = arith.constant 0 : index
    %c2_21 = arith.constant 2 : index
    %c0_22 = arith.constant 0 : index
    %40 = vector.load %arg1[%c0_20, %c2_21, %c0_22] : memref<1x4x290xf32, #tpu.memory_space<vmem>>, vector<1x1x256xf32>
    %41 = vector.shape_cast %40 : vector<1x1x256xf32> to vector<256xf32>
    %c0_23 = arith.constant 0 : index
    %c18 = arith.constant 18 : index
    %42 = memref.load %arg2[%c0_23, %c18] : memref<4x36xf32, #tpu.memory_space<smem>>
    %43 = vector.broadcast %42 : f32 to vector<256xf32>
    %44 = arith.mulf %41, %43 : vector<256xf32>
    %45 = arith.addf %27, %44 : vector<256xf32>
    %c1_24 = arith.constant 1 : index
    %c18_25 = arith.constant 18 : index
    %46 = memref.load %arg2[%c1_24, %c18_25] : memref<4x36xf32, #tpu.memory_space<smem>>
    %47 = vector.broadcast %46 : f32 to vector<256xf32>
    %48 = arith.mulf %41, %47 : vector<256xf32>
    %49 = arith.addf %31, %48 : vector<256xf32>
    %c2_26 = arith.constant 2 : index
    %c18_27 = arith.constant 18 : index
    %50 = memref.load %arg2[%c2_26, %c18_27] : memref<4x36xf32, #tpu.memory_space<smem>>
    %51 = vector.broadcast %50 : f32 to vector<256xf32>
    %52 = arith.mulf %41, %51 : vector<256xf32>
    %53 = arith.addf %35, %52 : vector<256xf32>
    %c3_28 = arith.constant 3 : index
    %c18_29 = arith.constant 18 : index
    %54 = memref.load %arg2[%c3_28, %c18_29] : memref<4x36xf32, #tpu.memory_space<smem>>
    %55 = vector.broadcast %54 : f32 to vector<256xf32>
    %56 = arith.mulf %41, %55 : vector<256xf32>
    %57 = arith.addf %39, %56 : vector<256xf32>
    %c0_30 = arith.constant 0 : index
    %c3_31 = arith.constant 3 : index
    %c0_32 = arith.constant 0 : index
    %58 = vector.load %arg1[%c0_30, %c3_31, %c0_32] : memref<1x4x290xf32, #tpu.memory_space<vmem>>, vector<1x1x256xf32>
    %59 = vector.shape_cast %58 : vector<1x1x256xf32> to vector<256xf32>
    %c0_33 = arith.constant 0 : index
    %c27 = arith.constant 27 : index
    %60 = memref.load %arg2[%c0_33, %c27] : memref<4x36xf32, #tpu.memory_space<smem>>
    %61 = vector.broadcast %60 : f32 to vector<256xf32>
    %62 = arith.mulf %59, %61 : vector<256xf32>
    %63 = arith.addf %45, %62 : vector<256xf32>
    %c1_34 = arith.constant 1 : index
    %c27_35 = arith.constant 27 : index
    %64 = memref.load %arg2[%c1_34, %c27_35] : memref<4x36xf32, #tpu.memory_space<smem>>
    %65 = vector.broadcast %64 : f32 to vector<256xf32>
    %66 = arith.mulf %59, %65 : vector<256xf32>
    %67 = arith.addf %49, %66 : vector<256xf32>
    %c2_36 = arith.constant 2 : index
    %c27_37 = arith.constant 27 : index
    %68 = memref.load %arg2[%c2_36, %c27_37] : memref<4x36xf32, #tpu.memory_space<smem>>
    %69 = vector.broadcast %68 : f32 to vector<256xf32>
    %70 = arith.mulf %59, %69 : vector<256xf32>
    %71 = arith.addf %53, %70 : vector<256xf32>
    %c3_38 = arith.constant 3 : index
    %c27_39 = arith.constant 27 : index
    %72 = memref.load %arg2[%c3_38, %c27_39] : memref<4x36xf32, #tpu.memory_space<smem>>
    %73 = vector.broadcast %72 : f32 to vector<256xf32>
    %74 = arith.mulf %59, %73 : vector<256xf32>
    %75 = arith.addf %57, %74 : vector<256xf32>
    %c0_40 = arith.constant 0 : index
    %c0_41 = arith.constant 0 : index
    %c1_42 = arith.constant 1 : index
    %76 = vector.load %arg1[%c0_40, %c0_41, %c1_42] : memref<1x4x290xf32, #tpu.memory_space<vmem>>, vector<1x1x256xf32>
    %77 = vector.shape_cast %76 : vector<1x1x256xf32> to vector<256xf32>
    %c0_43 = arith.constant 0 : index
    %c1_44 = arith.constant 1 : index
    %78 = memref.load %arg2[%c0_43, %c1_44] : memref<4x36xf32, #tpu.memory_space<smem>>
    %79 = vector.broadcast %78 : f32 to vector<256xf32>
    %80 = arith.mulf %77, %79 : vector<256xf32>
    %81 = arith.addf %63, %80 : vector<256xf32>
    %c1_45 = arith.constant 1 : index
    %c1_46 = arith.constant 1 : index
    %82 = memref.load %arg2[%c1_45, %c1_46] : memref<4x36xf32, #tpu.memory_space<smem>>
    %83 = vector.broadcast %82 : f32 to vector<256xf32>
    %84 = arith.mulf %77, %83 : vector<256xf32>
    %85 = arith.addf %67, %84 : vector<256xf32>
    %c2_47 = arith.constant 2 : index
    %c1_48 = arith.constant 1 : index
    %86 = memref.load %arg2[%c2_47, %c1_48] : memref<4x36xf32, #tpu.memory_space<smem>>
    %87 = vector.broadcast %86 : f32 to vector<256xf32>
    %88 = arith.mulf %77, %87 : vector<256xf32>
    %89 = arith.addf %71, %88 : vector<256xf32>
    %c3_49 = arith.constant 3 : index
    %c1_50 = arith.constant 1 : index
    %90 = memref.load %arg2[%c3_49, %c1_50] : memref<4x36xf32, #tpu.memory_space<smem>>
    %91 = vector.broadcast %90 : f32 to vector<256xf32>
    %92 = arith.mulf %77, %91 : vector<256xf32>
    %93 = arith.addf %75, %92 : vector<256xf32>
    %c0_51 = arith.constant 0 : index
    %c1_52 = arith.constant 1 : index
    %c1_53 = arith.constant 1 : index
    %94 = vector.load %arg1[%c0_51, %c1_52, %c1_53] : memref<1x4x290xf32, #tpu.memory_space<vmem>>, vector<1x1x256xf32>
    %95 = vector.shape_cast %94 : vector<1x1x256xf32> to vector<256xf32>
    %c0_54 = arith.constant 0 : index
    %c10 = arith.constant 10 : index
    %96 = memref.load %arg2[%c0_54, %c10] : memref<4x36xf32, #tpu.memory_space<smem>>
    %97 = vector.broadcast %96 : f32 to vector<256xf32>
    %98 = arith.mulf %95, %97 : vector<256xf32>
    %99 = arith.addf %81, %98 : vector<256xf32>
    %c1_55 = arith.constant 1 : index
    %c10_56 = arith.constant 10 : index
    %100 = memref.load %arg2[%c1_55, %c10_56] : memref<4x36xf32, #tpu.memory_space<smem>>
    %101 = vector.broadcast %100 : f32 to vector<256xf32>
    %102 = arith.mulf %95, %101 : vector<256xf32>
    %103 = arith.addf %85, %102 : vector<256xf32>
    %c2_57 = arith.constant 2 : index
    %c10_58 = arith.constant 10 : index
    %104 = memref.load %arg2[%c2_57, %c10_58] : memref<4x36xf32, #tpu.memory_space<smem>>
    %105 = vector.broadcast %104 : f32 to vector<256xf32>
    %106 = arith.mulf %95, %105 : vector<256xf32>
    %107 = arith.addf %89, %106 : vector<256xf32>
    %c3_59 = arith.constant 3 : index
    %c10_60 = arith.constant 10 : index
    %108 = memref.load %arg2[%c3_59, %c10_60] : memref<4x36xf32, #tpu.memory_space<smem>>
    %109 = vector.broadcast %108 : f32 to vector<256xf32>
    %110 = arith.mulf %95, %109 : vector<256xf32>
    %111 = arith.addf %93, %110 : vector<256xf32>
    %c0_61 = arith.constant 0 : index
    %c2_62 = arith.constant 2 : index
    %c1_63 = arith.constant 1 : index
    %112 = vector.load %arg1[%c0_61, %c2_62, %c1_63] : memref<1x4x290xf32, #tpu.memory_space<vmem>>, vector<1x1x256xf32>
    %113 = vector.shape_cast %112 : vector<1x1x256xf32> to vector<256xf32>
    %c0_64 = arith.constant 0 : index
    %c19 = arith.constant 19 : index
    %114 = memref.load %arg2[%c0_64, %c19] : memref<4x36xf32, #tpu.memory_space<smem>>
    %115 = vector.broadcast %114 : f32 to vector<256xf32>
    %116 = arith.mulf %113, %115 : vector<256xf32>
    %117 = arith.addf %99, %116 : vector<256xf32>
    %c1_65 = arith.constant 1 : index
    %c19_66 = arith.constant 19 : index
    %118 = memref.load %arg2[%c1_65, %c19_66] : memref<4x36xf32, #tpu.memory_space<smem>>
    %119 = vector.broadcast %118 : f32 to vector<256xf32>
    %120 = arith.mulf %113, %119 : vector<256xf32>
    %121 = arith.addf %103, %120 : vector<256xf32>
    %c2_67 = arith.constant 2 : index
    %c19_68 = arith.constant 19 : index
    %122 = memref.load %arg2[%c2_67, %c19_68] : memref<4x36xf32, #tpu.memory_space<smem>>
    %123 = vector.broadcast %122 : f32 to vector<256xf32>
    %124 = arith.mulf %113, %123 : vector<256xf32>
    %125 = arith.addf %107, %124 : vector<256xf32>
    %c3_69 = arith.constant 3 : index
    %c19_70 = arith.constant 19 : index
    %126 = memref.load %arg2[%c3_69, %c19_70] : memref<4x36xf32, #tpu.memory_space<smem>>
    %127 = vector.broadcast %126 : f32 to vector<256xf32>
    %128 = arith.mulf %113, %127 : vector<256xf32>
    %129 = arith.addf %111, %128 : vector<256xf32>
    %c0_71 = arith.constant 0 : index
    %c3_72 = arith.constant 3 : index
    %c1_73 = arith.constant 1 : index
    %130 = vector.load %arg1[%c0_71, %c3_72, %c1_73] : memref<1x4x290xf32, #tpu.memory_space<vmem>>, vector<1x1x256xf32>
    %131 = vector.shape_cast %130 : vector<1x1x256xf32> to vector<256xf32>
    %c0_74 = arith.constant 0 : index
    %c28 = arith.constant 28 : index
    %132 = memref.load %arg2[%c0_74, %c28] : memref<4x36xf32, #tpu.memory_space<smem>>
    %133 = vector.broadcast %132 : f32 to vector<256xf32>
    %134 = arith.mulf %131, %133 : vector<256xf32>
    %135 = arith.addf %117, %134 : vector<256xf32>
    %c1_75 = arith.constant 1 : index
    %c28_76 = arith.constant 28 : index
    %136 = memref.load %arg2[%c1_75, %c28_76] : memref<4x36xf32, #tpu.memory_space<smem>>
    %137 = vector.broadcast %136 : f32 to vector<256xf32>
    %138 = arith.mulf %131, %137 : vector<256xf32>
    %139 = arith.addf %121, %138 : vector<256xf32>
    %c2_77 = arith.constant 2 : index
    %c28_78 = arith.constant 28 : index
    %140 = memref.load %arg2[%c2_77, %c28_78] : memref<4x36xf32, #tpu.memory_space<smem>>
    %141 = vector.broadcast %140 : f32 to vector<256xf32>
    %142 = arith.mulf %131, %141 : vector<256xf32>
    %143 = arith.addf %125, %142 : vector<256xf32>
    %c3_79 = arith.constant 3 : index
    %c28_80 = arith.constant 28 : index
    %144 = memref.load %arg2[%c3_79, %c28_80] : memref<4x36xf32, #tpu.memory_space<smem>>
    %145 = vector.broadcast %144 : f32 to vector<256xf32>
    %146 = arith.mulf %131, %145 : vector<256xf32>
    %147 = arith.addf %129, %146 : vector<256xf32>
    %c0_81 = arith.constant 0 : index
    %c0_82 = arith.constant 0 : index
    %c2_83 = arith.constant 2 : index
    %148 = vector.load %arg1[%c0_81, %c0_82, %c2_83] : memref<1x4x290xf32, #tpu.memory_space<vmem>>, vector<1x1x256xf32>
    %149 = vector.shape_cast %148 : vector<1x1x256xf32> to vector<256xf32>
    %c0_84 = arith.constant 0 : index
    %c2_85 = arith.constant 2 : index
    %150 = memref.load %arg2[%c0_84, %c2_85] : memref<4x36xf32, #tpu.memory_space<smem>>
    %151 = vector.broadcast %150 : f32 to vector<256xf32>
    %152 = arith.mulf %149, %151 : vector<256xf32>
    %153 = arith.addf %135, %152 : vector<256xf32>
    %c1_86 = arith.constant 1 : index
    %c2_87 = arith.constant 2 : index
    %154 = memref.load %arg2[%c1_86, %c2_87] : memref<4x36xf32, #tpu.memory_space<smem>>
    %155 = vector.broadcast %154 : f32 to vector<256xf32>
    %156 = arith.mulf %149, %155 : vector<256xf32>
    %157 = arith.addf %139, %156 : vector<256xf32>
    %c2_88 = arith.constant 2 : index
    %c2_89 = arith.constant 2 : index
    %158 = memref.load %arg2[%c2_88, %c2_89] : memref<4x36xf32, #tpu.memory_space<smem>>
    %159 = vector.broadcast %158 : f32 to vector<256xf32>
    %160 = arith.mulf %149, %159 : vector<256xf32>
    %161 = arith.addf %143, %160 : vector<256xf32>
    %c3_90 = arith.constant 3 : index
    %c2_91 = arith.constant 2 : index
    %162 = memref.load %arg2[%c3_90, %c2_91] : memref<4x36xf32, #tpu.memory_space<smem>>
    %163 = vector.broadcast %162 : f32 to vector<256xf32>
    %164 = arith.mulf %149, %163 : vector<256xf32>
    %165 = arith.addf %147, %164 : vector<256xf32>
    %c0_92 = arith.constant 0 : index
    %c1_93 = arith.constant 1 : index
    %c2_94 = arith.constant 2 : index
    %166 = vector.load %arg1[%c0_92, %c1_93, %c2_94] : memref<1x4x290xf32, #tpu.memory_space<vmem>>, vector<1x1x256xf32>
    %167 = vector.shape_cast %166 : vector<1x1x256xf32> to vector<256xf32>
    %c0_95 = arith.constant 0 : index
    %c11 = arith.constant 11 : index
    %168 = memref.load %arg2[%c0_95, %c11] : memref<4x36xf32, #tpu.memory_space<smem>>
    %169 = vector.broadcast %168 : f32 to vector<256xf32>
    %170 = arith.mulf %167, %169 : vector<256xf32>
    %171 = arith.addf %153, %170 : vector<256xf32>
    %c1_96 = arith.constant 1 : index
    %c11_97 = arith.constant 11 : index
    %172 = memref.load %arg2[%c1_96, %c11_97] : memref<4x36xf32, #tpu.memory_space<smem>>
    %173 = vector.broadcast %172 : f32 to vector<256xf32>
    %174 = arith.mulf %167, %173 : vector<256xf32>
    %175 = arith.addf %157, %174 : vector<256xf32>
    %c2_98 = arith.constant 2 : index
    %c11_99 = arith.constant 11 : index
    %176 = memref.load %arg2[%c2_98, %c11_99] : memref<4x36xf32, #tpu.memory_space<smem>>
    %177 = vector.broadcast %176 : f32 to vector<256xf32>
    %178 = arith.mulf %167, %177 : vector<256xf32>
    %179 = arith.addf %161, %178 : vector<256xf32>
    %c3_100 = arith.constant 3 : index
    %c11_101 = arith.constant 11 : index
    %180 = memref.load %arg2[%c3_100, %c11_101] : memref<4x36xf32, #tpu.memory_space<smem>>
    %181 = vector.broadcast %180 : f32 to vector<256xf32>
    %182 = arith.mulf %167, %181 : vector<256xf32>
    %183 = arith.addf %165, %182 : vector<256xf32>
    %c0_102 = arith.constant 0 : index
    %c2_103 = arith.constant 2 : index
    %c2_104 = arith.constant 2 : index
    %184 = vector.load %arg1[%c0_102, %c2_103, %c2_104] : memref<1x4x290xf32, #tpu.memory_space<vmem>>, vector<1x1x256xf32>
    %185 = vector.shape_cast %184 : vector<1x1x256xf32> to vector<256xf32>
    %c0_105 = arith.constant 0 : index
    %c20 = arith.constant 20 : index
    %186 = memref.load %arg2[%c0_105, %c20] : memref<4x36xf32, #tpu.memory_space<smem>>
    %187 = vector.broadcast %186 : f32 to vector<256xf32>
    %188 = arith.mulf %185, %187 : vector<256xf32>
    %189 = arith.addf %171, %188 : vector<256xf32>
    %c1_106 = arith.constant 1 : index
    %c20_107 = arith.constant 20 : index
    %190 = memref.load %arg2[%c1_106, %c20_107] : memref<4x36xf32, #tpu.memory_space<smem>>
    %191 = vector.broadcast %190 : f32 to vector<256xf32>
    %192 = arith.mulf %185, %191 : vector<256xf32>
    %193 = arith.addf %175, %192 : vector<256xf32>
    %c2_108 = arith.constant 2 : index
    %c20_109 = arith.constant 20 : index
    %194 = memref.load %arg2[%c2_108, %c20_109] : memref<4x36xf32, #tpu.memory_space<smem>>
    %195 = vector.broadcast %194 : f32 to vector<256xf32>
    %196 = arith.mulf %185, %195 : vector<256xf32>
    %197 = arith.addf %179, %196 : vector<256xf32>
    %c3_110 = arith.constant 3 : index
    %c20_111 = arith.constant 20 : index
    %198 = memref.load %arg2[%c3_110, %c20_111] : memref<4x36xf32, #tpu.memory_space<smem>>
    %199 = vector.broadcast %198 : f32 to vector<256xf32>
    %200 = arith.mulf %185, %199 : vector<256xf32>
    %201 = arith.addf %183, %200 : vector<256xf32>
    %c0_112 = arith.constant 0 : index
    %c3_113 = arith.constant 3 : index
    %c2_114 = arith.constant 2 : index
    %202 = vector.load %arg1[%c0_112, %c3_113, %c2_114] : memref<1x4x290xf32, #tpu.memory_space<vmem>>, vector<1x1x256xf32>
    %203 = vector.shape_cast %202 : vector<1x1x256xf32> to vector<256xf32>
    %c0_115 = arith.constant 0 : index
    %c29 = arith.constant 29 : index
    %204 = memref.load %arg2[%c0_115, %c29] : memref<4x36xf32, #tpu.memory_space<smem>>
    %205 = vector.broadcast %204 : f32 to vector<256xf32>
    %206 = arith.mulf %203, %205 : vector<256xf32>
    %207 = arith.addf %189, %206 : vector<256xf32>
    %c1_116 = arith.constant 1 : index
    %c29_117 = arith.constant 29 : index
    %208 = memref.load %arg2[%c1_116, %c29_117] : memref<4x36xf32, #tpu.memory_space<smem>>
    %209 = vector.broadcast %208 : f32 to vector<256xf32>
    %210 = arith.mulf %203, %209 : vector<256xf32>
    %211 = arith.addf %193, %210 : vector<256xf32>
    %c2_118 = arith.constant 2 : index
    %c29_119 = arith.constant 29 : index
    %212 = memref.load %arg2[%c2_118, %c29_119] : memref<4x36xf32, #tpu.memory_space<smem>>
    %213 = vector.broadcast %212 : f32 to vector<256xf32>
    %214 = arith.mulf %203, %213 : vector<256xf32>
    %215 = arith.addf %197, %214 : vector<256xf32>
    %c3_120 = arith.constant 3 : index
    %c29_121 = arith.constant 29 : index
    %216 = memref.load %arg2[%c3_120, %c29_121] : memref<4x36xf32, #tpu.memory_space<smem>>
    %217 = vector.broadcast %216 : f32 to vector<256xf32>
    %218 = arith.mulf %203, %217 : vector<256xf32>
    %219 = arith.addf %201, %218 : vector<256xf32>
    %c0_122 = arith.constant 0 : index
    %c0_123 = arith.constant 0 : index
    %c16 = arith.constant 16 : index
    %220 = vector.load %arg1[%c0_122, %c0_123, %c16] : memref<1x4x290xf32, #tpu.memory_space<vmem>>, vector<1x1x256xf32>
    %221 = vector.shape_cast %220 : vector<1x1x256xf32> to vector<256xf32>
    %c0_124 = arith.constant 0 : index
    %c3_125 = arith.constant 3 : index
    %222 = memref.load %arg2[%c0_124, %c3_125] : memref<4x36xf32, #tpu.memory_space<smem>>
    %223 = vector.broadcast %222 : f32 to vector<256xf32>
    %224 = arith.mulf %221, %223 : vector<256xf32>
    %225 = arith.addf %207, %224 : vector<256xf32>
    %c1_126 = arith.constant 1 : index
    %c3_127 = arith.constant 3 : index
    %226 = memref.load %arg2[%c1_126, %c3_127] : memref<4x36xf32, #tpu.memory_space<smem>>
    %227 = vector.broadcast %226 : f32 to vector<256xf32>
    %228 = arith.mulf %221, %227 : vector<256xf32>
    %229 = arith.addf %211, %228 : vector<256xf32>
    %c2_128 = arith.constant 2 : index
    %c3_129 = arith.constant 3 : index
    %230 = memref.load %arg2[%c2_128, %c3_129] : memref<4x36xf32, #tpu.memory_space<smem>>
    %231 = vector.broadcast %230 : f32 to vector<256xf32>
    %232 = arith.mulf %221, %231 : vector<256xf32>
    %233 = arith.addf %215, %232 : vector<256xf32>
    %c3_130 = arith.constant 3 : index
    %c3_131 = arith.constant 3 : index
    %234 = memref.load %arg2[%c3_130, %c3_131] : memref<4x36xf32, #tpu.memory_space<smem>>
    %235 = vector.broadcast %234 : f32 to vector<256xf32>
    %236 = arith.mulf %221, %235 : vector<256xf32>
    %237 = arith.addf %219, %236 : vector<256xf32>
    %c0_132 = arith.constant 0 : index
    %c1_133 = arith.constant 1 : index
    %c16_134 = arith.constant 16 : index
    %238 = vector.load %arg1[%c0_132, %c1_133, %c16_134] : memref<1x4x290xf32, #tpu.memory_space<vmem>>, vector<1x1x256xf32>
    %239 = vector.shape_cast %238 : vector<1x1x256xf32> to vector<256xf32>
    %c0_135 = arith.constant 0 : index
    %c12 = arith.constant 12 : index
    %240 = memref.load %arg2[%c0_135, %c12] : memref<4x36xf32, #tpu.memory_space<smem>>
    %241 = vector.broadcast %240 : f32 to vector<256xf32>
    %242 = arith.mulf %239, %241 : vector<256xf32>
    %243 = arith.addf %225, %242 : vector<256xf32>
    %c1_136 = arith.constant 1 : index
    %c12_137 = arith.constant 12 : index
    %244 = memref.load %arg2[%c1_136, %c12_137] : memref<4x36xf32, #tpu.memory_space<smem>>
    %245 = vector.broadcast %244 : f32 to vector<256xf32>
    %246 = arith.mulf %239, %245 : vector<256xf32>
    %247 = arith.addf %229, %246 : vector<256xf32>
    %c2_138 = arith.constant 2 : index
    %c12_139 = arith.constant 12 : index
    %248 = memref.load %arg2[%c2_138, %c12_139] : memref<4x36xf32, #tpu.memory_space<smem>>
    %249 = vector.broadcast %248 : f32 to vector<256xf32>
    %250 = arith.mulf %239, %249 : vector<256xf32>
    %251 = arith.addf %233, %250 : vector<256xf32>
    %c3_140 = arith.constant 3 : index
    %c12_141 = arith.constant 12 : index
    %252 = memref.load %arg2[%c3_140, %c12_141] : memref<4x36xf32, #tpu.memory_space<smem>>
    %253 = vector.broadcast %252 : f32 to vector<256xf32>
    %254 = arith.mulf %239, %253 : vector<256xf32>
    %255 = arith.addf %237, %254 : vector<256xf32>
    %c0_142 = arith.constant 0 : index
    %c2_143 = arith.constant 2 : index
    %c16_144 = arith.constant 16 : index
    %256 = vector.load %arg1[%c0_142, %c2_143, %c16_144] : memref<1x4x290xf32, #tpu.memory_space<vmem>>, vector<1x1x256xf32>
    %257 = vector.shape_cast %256 : vector<1x1x256xf32> to vector<256xf32>
    %c0_145 = arith.constant 0 : index
    %c21 = arith.constant 21 : index
    %258 = memref.load %arg2[%c0_145, %c21] : memref<4x36xf32, #tpu.memory_space<smem>>
    %259 = vector.broadcast %258 : f32 to vector<256xf32>
    %260 = arith.mulf %257, %259 : vector<256xf32>
    %261 = arith.addf %243, %260 : vector<256xf32>
    %c1_146 = arith.constant 1 : index
    %c21_147 = arith.constant 21 : index
    %262 = memref.load %arg2[%c1_146, %c21_147] : memref<4x36xf32, #tpu.memory_space<smem>>
    %263 = vector.broadcast %262 : f32 to vector<256xf32>
    %264 = arith.mulf %257, %263 : vector<256xf32>
    %265 = arith.addf %247, %264 : vector<256xf32>
    %c2_148 = arith.constant 2 : index
    %c21_149 = arith.constant 21 : index
    %266 = memref.load %arg2[%c2_148, %c21_149] : memref<4x36xf32, #tpu.memory_space<smem>>
    %267 = vector.broadcast %266 : f32 to vector<256xf32>
    %268 = arith.mulf %257, %267 : vector<256xf32>
    %269 = arith.addf %251, %268 : vector<256xf32>
    %c3_150 = arith.constant 3 : index
    %c21_151 = arith.constant 21 : index
    %270 = memref.load %arg2[%c3_150, %c21_151] : memref<4x36xf32, #tpu.memory_space<smem>>
    %271 = vector.broadcast %270 : f32 to vector<256xf32>
    %272 = arith.mulf %257, %271 : vector<256xf32>
    %273 = arith.addf %255, %272 : vector<256xf32>
    %c0_152 = arith.constant 0 : index
    %c3_153 = arith.constant 3 : index
    %c16_154 = arith.constant 16 : index
    %274 = vector.load %arg1[%c0_152, %c3_153, %c16_154] : memref<1x4x290xf32, #tpu.memory_space<vmem>>, vector<1x1x256xf32>
    %275 = vector.shape_cast %274 : vector<1x1x256xf32> to vector<256xf32>
    %c0_155 = arith.constant 0 : index
    %c30 = arith.constant 30 : index
    %276 = memref.load %arg2[%c0_155, %c30] : memref<4x36xf32, #tpu.memory_space<smem>>
    %277 = vector.broadcast %276 : f32 to vector<256xf32>
    %278 = arith.mulf %275, %277 : vector<256xf32>
    %279 = arith.addf %261, %278 : vector<256xf32>
    %c1_156 = arith.constant 1 : index
    %c30_157 = arith.constant 30 : index
    %280 = memref.load %arg2[%c1_156, %c30_157] : memref<4x36xf32, #tpu.memory_space<smem>>
    %281 = vector.broadcast %280 : f32 to vector<256xf32>
    %282 = arith.mulf %275, %281 : vector<256xf32>
    %283 = arith.addf %265, %282 : vector<256xf32>
    %c2_158 = arith.constant 2 : index
    %c30_159 = arith.constant 30 : index
    %284 = memref.load %arg2[%c2_158, %c30_159] : memref<4x36xf32, #tpu.memory_space<smem>>
    %285 = vector.broadcast %284 : f32 to vector<256xf32>
    %286 = arith.mulf %275, %285 : vector<256xf32>
    %287 = arith.addf %269, %286 : vector<256xf32>
    %c3_160 = arith.constant 3 : index
    %c30_161 = arith.constant 30 : index
    %288 = memref.load %arg2[%c3_160, %c30_161] : memref<4x36xf32, #tpu.memory_space<smem>>
    %289 = vector.broadcast %288 : f32 to vector<256xf32>
    %290 = arith.mulf %275, %289 : vector<256xf32>
    %291 = arith.addf %273, %290 : vector<256xf32>
    %c0_162 = arith.constant 0 : index
    %c0_163 = arith.constant 0 : index
    %c17 = arith.constant 17 : index
    %292 = vector.load %arg1[%c0_162, %c0_163, %c17] : memref<1x4x290xf32, #tpu.memory_space<vmem>>, vector<1x1x256xf32>
    %293 = vector.shape_cast %292 : vector<1x1x256xf32> to vector<256xf32>
    %c0_164 = arith.constant 0 : index
    %c4 = arith.constant 4 : index
    %294 = memref.load %arg2[%c0_164, %c4] : memref<4x36xf32, #tpu.memory_space<smem>>
    %295 = vector.broadcast %294 : f32 to vector<256xf32>
    %296 = arith.mulf %293, %295 : vector<256xf32>
    %297 = arith.addf %279, %296 : vector<256xf32>
    %c1_165 = arith.constant 1 : index
    %c4_166 = arith.constant 4 : index
    %298 = memref.load %arg2[%c1_165, %c4_166] : memref<4x36xf32, #tpu.memory_space<smem>>
    %299 = vector.broadcast %298 : f32 to vector<256xf32>
    %300 = arith.mulf %293, %299 : vector<256xf32>
    %301 = arith.addf %283, %300 : vector<256xf32>
    %c2_167 = arith.constant 2 : index
    %c4_168 = arith.constant 4 : index
    %302 = memref.load %arg2[%c2_167, %c4_168] : memref<4x36xf32, #tpu.memory_space<smem>>
    %303 = vector.broadcast %302 : f32 to vector<256xf32>
    %304 = arith.mulf %293, %303 : vector<256xf32>
    %305 = arith.addf %287, %304 : vector<256xf32>
    %c3_169 = arith.constant 3 : index
    %c4_170 = arith.constant 4 : index
    %306 = memref.load %arg2[%c3_169, %c4_170] : memref<4x36xf32, #tpu.memory_space<smem>>
    %307 = vector.broadcast %306 : f32 to vector<256xf32>
    %308 = arith.mulf %293, %307 : vector<256xf32>
    %309 = arith.addf %291, %308 : vector<256xf32>
    %c0_171 = arith.constant 0 : index
    %c1_172 = arith.constant 1 : index
    %c17_173 = arith.constant 17 : index
    %310 = vector.load %arg1[%c0_171, %c1_172, %c17_173] : memref<1x4x290xf32, #tpu.memory_space<vmem>>, vector<1x1x256xf32>
    %311 = vector.shape_cast %310 : vector<1x1x256xf32> to vector<256xf32>
    %c0_174 = arith.constant 0 : index
    %c13 = arith.constant 13 : index
    %312 = memref.load %arg2[%c0_174, %c13] : memref<4x36xf32, #tpu.memory_space<smem>>
    %313 = vector.broadcast %312 : f32 to vector<256xf32>
    %314 = arith.mulf %311, %313 : vector<256xf32>
    %315 = arith.addf %297, %314 : vector<256xf32>
    %c1_175 = arith.constant 1 : index
    %c13_176 = arith.constant 13 : index
    %316 = memref.load %arg2[%c1_175, %c13_176] : memref<4x36xf32, #tpu.memory_space<smem>>
    %317 = vector.broadcast %316 : f32 to vector<256xf32>
    %318 = arith.mulf %311, %317 : vector<256xf32>
    %319 = arith.addf %301, %318 : vector<256xf32>
    %c2_177 = arith.constant 2 : index
    %c13_178 = arith.constant 13 : index
    %320 = memref.load %arg2[%c2_177, %c13_178] : memref<4x36xf32, #tpu.memory_space<smem>>
    %321 = vector.broadcast %320 : f32 to vector<256xf32>
    %322 = arith.mulf %311, %321 : vector<256xf32>
    %323 = arith.addf %305, %322 : vector<256xf32>
    %c3_179 = arith.constant 3 : index
    %c13_180 = arith.constant 13 : index
    %324 = memref.load %arg2[%c3_179, %c13_180] : memref<4x36xf32, #tpu.memory_space<smem>>
    %325 = vector.broadcast %324 : f32 to vector<256xf32>
    %326 = arith.mulf %311, %325 : vector<256xf32>
    %327 = arith.addf %309, %326 : vector<256xf32>
    %c0_181 = arith.constant 0 : index
    %c2_182 = arith.constant 2 : index
    %c17_183 = arith.constant 17 : index
    %328 = vector.load %arg1[%c0_181, %c2_182, %c17_183] : memref<1x4x290xf32, #tpu.memory_space<vmem>>, vector<1x1x256xf32>
    %329 = vector.shape_cast %328 : vector<1x1x256xf32> to vector<256xf32>
    %c0_184 = arith.constant 0 : index
    %c22 = arith.constant 22 : index
    %330 = memref.load %arg2[%c0_184, %c22] : memref<4x36xf32, #tpu.memory_space<smem>>
    %331 = vector.broadcast %330 : f32 to vector<256xf32>
    %332 = arith.mulf %329, %331 : vector<256xf32>
    %333 = arith.addf %315, %332 : vector<256xf32>
    %c1_185 = arith.constant 1 : index
    %c22_186 = arith.constant 22 : index
    %334 = memref.load %arg2[%c1_185, %c22_186] : memref<4x36xf32, #tpu.memory_space<smem>>
    %335 = vector.broadcast %334 : f32 to vector<256xf32>
    %336 = arith.mulf %329, %335 : vector<256xf32>
    %337 = arith.addf %319, %336 : vector<256xf32>
    %c2_187 = arith.constant 2 : index
    %c22_188 = arith.constant 22 : index
    %338 = memref.load %arg2[%c2_187, %c22_188] : memref<4x36xf32, #tpu.memory_space<smem>>
    %339 = vector.broadcast %338 : f32 to vector<256xf32>
    %340 = arith.mulf %329, %339 : vector<256xf32>
    %341 = arith.addf %323, %340 : vector<256xf32>
    %c3_189 = arith.constant 3 : index
    %c22_190 = arith.constant 22 : index
    %342 = memref.load %arg2[%c3_189, %c22_190] : memref<4x36xf32, #tpu.memory_space<smem>>
    %343 = vector.broadcast %342 : f32 to vector<256xf32>
    %344 = arith.mulf %329, %343 : vector<256xf32>
    %345 = arith.addf %327, %344 : vector<256xf32>
    %c0_191 = arith.constant 0 : index
    %c3_192 = arith.constant 3 : index
    %c17_193 = arith.constant 17 : index
    %346 = vector.load %arg1[%c0_191, %c3_192, %c17_193] : memref<1x4x290xf32, #tpu.memory_space<vmem>>, vector<1x1x256xf32>
    %347 = vector.shape_cast %346 : vector<1x1x256xf32> to vector<256xf32>
    %c0_194 = arith.constant 0 : index
    %c31 = arith.constant 31 : index
    %348 = memref.load %arg2[%c0_194, %c31] : memref<4x36xf32, #tpu.memory_space<smem>>
    %349 = vector.broadcast %348 : f32 to vector<256xf32>
    %350 = arith.mulf %347, %349 : vector<256xf32>
    %351 = arith.addf %333, %350 : vector<256xf32>
    %c1_195 = arith.constant 1 : index
    %c31_196 = arith.constant 31 : index
    %352 = memref.load %arg2[%c1_195, %c31_196] : memref<4x36xf32, #tpu.memory_space<smem>>
    %353 = vector.broadcast %352 : f32 to vector<256xf32>
    %354 = arith.mulf %347, %353 : vector<256xf32>
    %355 = arith.addf %337, %354 : vector<256xf32>
    %c2_197 = arith.constant 2 : index
    %c31_198 = arith.constant 31 : index
    %356 = memref.load %arg2[%c2_197, %c31_198] : memref<4x36xf32, #tpu.memory_space<smem>>
    %357 = vector.broadcast %356 : f32 to vector<256xf32>
    %358 = arith.mulf %347, %357 : vector<256xf32>
    %359 = arith.addf %341, %358 : vector<256xf32>
    %c3_199 = arith.constant 3 : index
    %c31_200 = arith.constant 31 : index
    %360 = memref.load %arg2[%c3_199, %c31_200] : memref<4x36xf32, #tpu.memory_space<smem>>
    %361 = vector.broadcast %360 : f32 to vector<256xf32>
    %362 = arith.mulf %347, %361 : vector<256xf32>
    %363 = arith.addf %345, %362 : vector<256xf32>
    %c0_201 = arith.constant 0 : index
    %c0_202 = arith.constant 0 : index
    %c18_203 = arith.constant 18 : index
    %364 = vector.load %arg1[%c0_201, %c0_202, %c18_203] : memref<1x4x290xf32, #tpu.memory_space<vmem>>, vector<1x1x256xf32>
    %365 = vector.shape_cast %364 : vector<1x1x256xf32> to vector<256xf32>
    %c0_204 = arith.constant 0 : index
    %c5 = arith.constant 5 : index
    %366 = memref.load %arg2[%c0_204, %c5] : memref<4x36xf32, #tpu.memory_space<smem>>
    %367 = vector.broadcast %366 : f32 to vector<256xf32>
    %368 = arith.mulf %365, %367 : vector<256xf32>
    %369 = arith.addf %351, %368 : vector<256xf32>
    %c1_205 = arith.constant 1 : index
    %c5_206 = arith.constant 5 : index
    %370 = memref.load %arg2[%c1_205, %c5_206] : memref<4x36xf32, #tpu.memory_space<smem>>
    %371 = vector.broadcast %370 : f32 to vector<256xf32>
    %372 = arith.mulf %365, %371 : vector<256xf32>
    %373 = arith.addf %355, %372 : vector<256xf32>
    %c2_207 = arith.constant 2 : index
    %c5_208 = arith.constant 5 : index
    %374 = memref.load %arg2[%c2_207, %c5_208] : memref<4x36xf32, #tpu.memory_space<smem>>
    %375 = vector.broadcast %374 : f32 to vector<256xf32>
    %376 = arith.mulf %365, %375 : vector<256xf32>
    %377 = arith.addf %359, %376 : vector<256xf32>
    %c3_209 = arith.constant 3 : index
    %c5_210 = arith.constant 5 : index
    %378 = memref.load %arg2[%c3_209, %c5_210] : memref<4x36xf32, #tpu.memory_space<smem>>
    %379 = vector.broadcast %378 : f32 to vector<256xf32>
    %380 = arith.mulf %365, %379 : vector<256xf32>
    %381 = arith.addf %363, %380 : vector<256xf32>
    %c0_211 = arith.constant 0 : index
    %c1_212 = arith.constant 1 : index
    %c18_213 = arith.constant 18 : index
    %382 = vector.load %arg1[%c0_211, %c1_212, %c18_213] : memref<1x4x290xf32, #tpu.memory_space<vmem>>, vector<1x1x256xf32>
    %383 = vector.shape_cast %382 : vector<1x1x256xf32> to vector<256xf32>
    %c0_214 = arith.constant 0 : index
    %c14 = arith.constant 14 : index
    %384 = memref.load %arg2[%c0_214, %c14] : memref<4x36xf32, #tpu.memory_space<smem>>
    %385 = vector.broadcast %384 : f32 to vector<256xf32>
    %386 = arith.mulf %383, %385 : vector<256xf32>
    %387 = arith.addf %369, %386 : vector<256xf32>
    %c1_215 = arith.constant 1 : index
    %c14_216 = arith.constant 14 : index
    %388 = memref.load %arg2[%c1_215, %c14_216] : memref<4x36xf32, #tpu.memory_space<smem>>
    %389 = vector.broadcast %388 : f32 to vector<256xf32>
    %390 = arith.mulf %383, %389 : vector<256xf32>
    %391 = arith.addf %373, %390 : vector<256xf32>
    %c2_217 = arith.constant 2 : index
    %c14_218 = arith.constant 14 : index
    %392 = memref.load %arg2[%c2_217, %c14_218] : memref<4x36xf32, #tpu.memory_space<smem>>
    %393 = vector.broadcast %392 : f32 to vector<256xf32>
    %394 = arith.mulf %383, %393 : vector<256xf32>
    %395 = arith.addf %377, %394 : vector<256xf32>
    %c3_219 = arith.constant 3 : index
    %c14_220 = arith.constant 14 : index
    %396 = memref.load %arg2[%c3_219, %c14_220] : memref<4x36xf32, #tpu.memory_space<smem>>
    %397 = vector.broadcast %396 : f32 to vector<256xf32>
    %398 = arith.mulf %383, %397 : vector<256xf32>
    %399 = arith.addf %381, %398 : vector<256xf32>
    %c0_221 = arith.constant 0 : index
    %c2_222 = arith.constant 2 : index
    %c18_223 = arith.constant 18 : index
    %400 = vector.load %arg1[%c0_221, %c2_222, %c18_223] : memref<1x4x290xf32, #tpu.memory_space<vmem>>, vector<1x1x256xf32>
    %401 = vector.shape_cast %400 : vector<1x1x256xf32> to vector<256xf32>
    %c0_224 = arith.constant 0 : index
    %c23 = arith.constant 23 : index
    %402 = memref.load %arg2[%c0_224, %c23] : memref<4x36xf32, #tpu.memory_space<smem>>
    %403 = vector.broadcast %402 : f32 to vector<256xf32>
    %404 = arith.mulf %401, %403 : vector<256xf32>
    %405 = arith.addf %387, %404 : vector<256xf32>
    %c1_225 = arith.constant 1 : index
    %c23_226 = arith.constant 23 : index
    %406 = memref.load %arg2[%c1_225, %c23_226] : memref<4x36xf32, #tpu.memory_space<smem>>
    %407 = vector.broadcast %406 : f32 to vector<256xf32>
    %408 = arith.mulf %401, %407 : vector<256xf32>
    %409 = arith.addf %391, %408 : vector<256xf32>
    %c2_227 = arith.constant 2 : index
    %c23_228 = arith.constant 23 : index
    %410 = memref.load %arg2[%c2_227, %c23_228] : memref<4x36xf32, #tpu.memory_space<smem>>
    %411 = vector.broadcast %410 : f32 to vector<256xf32>
    %412 = arith.mulf %401, %411 : vector<256xf32>
    %413 = arith.addf %395, %412 : vector<256xf32>
    %c3_229 = arith.constant 3 : index
    %c23_230 = arith.constant 23 : index
    %414 = memref.load %arg2[%c3_229, %c23_230] : memref<4x36xf32, #tpu.memory_space<smem>>
    %415 = vector.broadcast %414 : f32 to vector<256xf32>
    %416 = arith.mulf %401, %415 : vector<256xf32>
    %417 = arith.addf %399, %416 : vector<256xf32>
    %c0_231 = arith.constant 0 : index
    %c3_232 = arith.constant 3 : index
    %c18_233 = arith.constant 18 : index
    %418 = vector.load %arg1[%c0_231, %c3_232, %c18_233] : memref<1x4x290xf32, #tpu.memory_space<vmem>>, vector<1x1x256xf32>
    %419 = vector.shape_cast %418 : vector<1x1x256xf32> to vector<256xf32>
    %c0_234 = arith.constant 0 : index
    %c32 = arith.constant 32 : index
    %420 = memref.load %arg2[%c0_234, %c32] : memref<4x36xf32, #tpu.memory_space<smem>>
    %421 = vector.broadcast %420 : f32 to vector<256xf32>
    %422 = arith.mulf %419, %421 : vector<256xf32>
    %423 = arith.addf %405, %422 : vector<256xf32>
    %c1_235 = arith.constant 1 : index
    %c32_236 = arith.constant 32 : index
    %424 = memref.load %arg2[%c1_235, %c32_236] : memref<4x36xf32, #tpu.memory_space<smem>>
    %425 = vector.broadcast %424 : f32 to vector<256xf32>
    %426 = arith.mulf %419, %425 : vector<256xf32>
    %427 = arith.addf %409, %426 : vector<256xf32>
    %c2_237 = arith.constant 2 : index
    %c32_238 = arith.constant 32 : index
    %428 = memref.load %arg2[%c2_237, %c32_238] : memref<4x36xf32, #tpu.memory_space<smem>>
    %429 = vector.broadcast %428 : f32 to vector<256xf32>
    %430 = arith.mulf %419, %429 : vector<256xf32>
    %431 = arith.addf %413, %430 : vector<256xf32>
    %c3_239 = arith.constant 3 : index
    %c32_240 = arith.constant 32 : index
    %432 = memref.load %arg2[%c3_239, %c32_240] : memref<4x36xf32, #tpu.memory_space<smem>>
    %433 = vector.broadcast %432 : f32 to vector<256xf32>
    %434 = arith.mulf %419, %433 : vector<256xf32>
    %435 = arith.addf %417, %434 : vector<256xf32>
    %c0_241 = arith.constant 0 : index
    %c0_242 = arith.constant 0 : index
    %c32_243 = arith.constant 32 : index
    %436 = vector.load %arg1[%c0_241, %c0_242, %c32_243] : memref<1x4x290xf32, #tpu.memory_space<vmem>>, vector<1x1x256xf32>
    %437 = vector.shape_cast %436 : vector<1x1x256xf32> to vector<256xf32>
    %c0_244 = arith.constant 0 : index
    %c6 = arith.constant 6 : index
    %438 = memref.load %arg2[%c0_244, %c6] : memref<4x36xf32, #tpu.memory_space<smem>>
    %439 = vector.broadcast %438 : f32 to vector<256xf32>
    %440 = arith.mulf %437, %439 : vector<256xf32>
    %441 = arith.addf %423, %440 : vector<256xf32>
    %c1_245 = arith.constant 1 : index
    %c6_246 = arith.constant 6 : index
    %442 = memref.load %arg2[%c1_245, %c6_246] : memref<4x36xf32, #tpu.memory_space<smem>>
    %443 = vector.broadcast %442 : f32 to vector<256xf32>
    %444 = arith.mulf %437, %443 : vector<256xf32>
    %445 = arith.addf %427, %444 : vector<256xf32>
    %c2_247 = arith.constant 2 : index
    %c6_248 = arith.constant 6 : index
    %446 = memref.load %arg2[%c2_247, %c6_248] : memref<4x36xf32, #tpu.memory_space<smem>>
    %447 = vector.broadcast %446 : f32 to vector<256xf32>
    %448 = arith.mulf %437, %447 : vector<256xf32>
    %449 = arith.addf %431, %448 : vector<256xf32>
    %c3_249 = arith.constant 3 : index
    %c6_250 = arith.constant 6 : index
    %450 = memref.load %arg2[%c3_249, %c6_250] : memref<4x36xf32, #tpu.memory_space<smem>>
    %451 = vector.broadcast %450 : f32 to vector<256xf32>
    %452 = arith.mulf %437, %451 : vector<256xf32>
    %453 = arith.addf %435, %452 : vector<256xf32>
    %c0_251 = arith.constant 0 : index
    %c1_252 = arith.constant 1 : index
    %c32_253 = arith.constant 32 : index
    %454 = vector.load %arg1[%c0_251, %c1_252, %c32_253] : memref<1x4x290xf32, #tpu.memory_space<vmem>>, vector<1x1x256xf32>
    %455 = vector.shape_cast %454 : vector<1x1x256xf32> to vector<256xf32>
    %c0_254 = arith.constant 0 : index
    %c15 = arith.constant 15 : index
    %456 = memref.load %arg2[%c0_254, %c15] : memref<4x36xf32, #tpu.memory_space<smem>>
    %457 = vector.broadcast %456 : f32 to vector<256xf32>
    %458 = arith.mulf %455, %457 : vector<256xf32>
    %459 = arith.addf %441, %458 : vector<256xf32>
    %c1_255 = arith.constant 1 : index
    %c15_256 = arith.constant 15 : index
    %460 = memref.load %arg2[%c1_255, %c15_256] : memref<4x36xf32, #tpu.memory_space<smem>>
    %461 = vector.broadcast %460 : f32 to vector<256xf32>
    %462 = arith.mulf %455, %461 : vector<256xf32>
    %463 = arith.addf %445, %462 : vector<256xf32>
    %c2_257 = arith.constant 2 : index
    %c15_258 = arith.constant 15 : index
    %464 = memref.load %arg2[%c2_257, %c15_258] : memref<4x36xf32, #tpu.memory_space<smem>>
    %465 = vector.broadcast %464 : f32 to vector<256xf32>
    %466 = arith.mulf %455, %465 : vector<256xf32>
    %467 = arith.addf %449, %466 : vector<256xf32>
    %c3_259 = arith.constant 3 : index
    %c15_260 = arith.constant 15 : index
    %468 = memref.load %arg2[%c3_259, %c15_260] : memref<4x36xf32, #tpu.memory_space<smem>>
    %469 = vector.broadcast %468 : f32 to vector<256xf32>
    %470 = arith.mulf %455, %469 : vector<256xf32>
    %471 = arith.addf %453, %470 : vector<256xf32>
    %c0_261 = arith.constant 0 : index
    %c2_262 = arith.constant 2 : index
    %c32_263 = arith.constant 32 : index
    %472 = vector.load %arg1[%c0_261, %c2_262, %c32_263] : memref<1x4x290xf32, #tpu.memory_space<vmem>>, vector<1x1x256xf32>
    %473 = vector.shape_cast %472 : vector<1x1x256xf32> to vector<256xf32>
    %c0_264 = arith.constant 0 : index
    %c24 = arith.constant 24 : index
    %474 = memref.load %arg2[%c0_264, %c24] : memref<4x36xf32, #tpu.memory_space<smem>>
    %475 = vector.broadcast %474 : f32 to vector<256xf32>
    %476 = arith.mulf %473, %475 : vector<256xf32>
    %477 = arith.addf %459, %476 : vector<256xf32>
    %c1_265 = arith.constant 1 : index
    %c24_266 = arith.constant 24 : index
    %478 = memref.load %arg2[%c1_265, %c24_266] : memref<4x36xf32, #tpu.memory_space<smem>>
    %479 = vector.broadcast %478 : f32 to vector<256xf32>
    %480 = arith.mulf %473, %479 : vector<256xf32>
    %481 = arith.addf %463, %480 : vector<256xf32>
    %c2_267 = arith.constant 2 : index
    %c24_268 = arith.constant 24 : index
    %482 = memref.load %arg2[%c2_267, %c24_268] : memref<4x36xf32, #tpu.memory_space<smem>>
    %483 = vector.broadcast %482 : f32 to vector<256xf32>
    %484 = arith.mulf %473, %483 : vector<256xf32>
    %485 = arith.addf %467, %484 : vector<256xf32>
    %c3_269 = arith.constant 3 : index
    %c24_270 = arith.constant 24 : index
    %486 = memref.load %arg2[%c3_269, %c24_270] : memref<4x36xf32, #tpu.memory_space<smem>>
    %487 = vector.broadcast %486 : f32 to vector<256xf32>
    %488 = arith.mulf %473, %487 : vector<256xf32>
    %489 = arith.addf %471, %488 : vector<256xf32>
    %c0_271 = arith.constant 0 : index
    %c3_272 = arith.constant 3 : index
    %c32_273 = arith.constant 32 : index
    %490 = vector.load %arg1[%c0_271, %c3_272, %c32_273] : memref<1x4x290xf32, #tpu.memory_space<vmem>>, vector<1x1x256xf32>
    %491 = vector.shape_cast %490 : vector<1x1x256xf32> to vector<256xf32>
    %c0_274 = arith.constant 0 : index
    %c33 = arith.constant 33 : index
    %492 = memref.load %arg2[%c0_274, %c33] : memref<4x36xf32, #tpu.memory_space<smem>>
    %493 = vector.broadcast %492 : f32 to vector<256xf32>
    %494 = arith.mulf %491, %493 : vector<256xf32>
    %495 = arith.addf %477, %494 : vector<256xf32>
    %c1_275 = arith.constant 1 : index
    %c33_276 = arith.constant 33 : index
    %496 = memref.load %arg2[%c1_275, %c33_276] : memref<4x36xf32, #tpu.memory_space<smem>>
    %497 = vector.broadcast %496 : f32 to vector<256xf32>
    %498 = arith.mulf %491, %497 : vector<256xf32>
    %499 = arith.addf %481, %498 : vector<256xf32>
    %c2_277 = arith.constant 2 : index
    %c33_278 = arith.constant 33 : index
    %500 = memref.load %arg2[%c2_277, %c33_278] : memref<4x36xf32, #tpu.memory_space<smem>>
    %501 = vector.broadcast %500 : f32 to vector<256xf32>
    %502 = arith.mulf %491, %501 : vector<256xf32>
    %503 = arith.addf %485, %502 : vector<256xf32>
    %c3_279 = arith.constant 3 : index
    %c33_280 = arith.constant 33 : index
    %504 = memref.load %arg2[%c3_279, %c33_280] : memref<4x36xf32, #tpu.memory_space<smem>>
    %505 = vector.broadcast %504 : f32 to vector<256xf32>
    %506 = arith.mulf %491, %505 : vector<256xf32>
    %507 = arith.addf %489, %506 : vector<256xf32>
    %c0_281 = arith.constant 0 : index
    %c0_282 = arith.constant 0 : index
    %c33_283 = arith.constant 33 : index
    %508 = vector.load %arg1[%c0_281, %c0_282, %c33_283] : memref<1x4x290xf32, #tpu.memory_space<vmem>>, vector<1x1x256xf32>
    %509 = vector.shape_cast %508 : vector<1x1x256xf32> to vector<256xf32>
    %c0_284 = arith.constant 0 : index
    %c7 = arith.constant 7 : index
    %510 = memref.load %arg2[%c0_284, %c7] : memref<4x36xf32, #tpu.memory_space<smem>>
    %511 = vector.broadcast %510 : f32 to vector<256xf32>
    %512 = arith.mulf %509, %511 : vector<256xf32>
    %513 = arith.addf %495, %512 : vector<256xf32>
    %c1_285 = arith.constant 1 : index
    %c7_286 = arith.constant 7 : index
    %514 = memref.load %arg2[%c1_285, %c7_286] : memref<4x36xf32, #tpu.memory_space<smem>>
    %515 = vector.broadcast %514 : f32 to vector<256xf32>
    %516 = arith.mulf %509, %515 : vector<256xf32>
    %517 = arith.addf %499, %516 : vector<256xf32>
    %c2_287 = arith.constant 2 : index
    %c7_288 = arith.constant 7 : index
    %518 = memref.load %arg2[%c2_287, %c7_288] : memref<4x36xf32, #tpu.memory_space<smem>>
    %519 = vector.broadcast %518 : f32 to vector<256xf32>
    %520 = arith.mulf %509, %519 : vector<256xf32>
    %521 = arith.addf %503, %520 : vector<256xf32>
    %c3_289 = arith.constant 3 : index
    %c7_290 = arith.constant 7 : index
    %522 = memref.load %arg2[%c3_289, %c7_290] : memref<4x36xf32, #tpu.memory_space<smem>>
    %523 = vector.broadcast %522 : f32 to vector<256xf32>
    %524 = arith.mulf %509, %523 : vector<256xf32>
    %525 = arith.addf %507, %524 : vector<256xf32>
    %c0_291 = arith.constant 0 : index
    %c1_292 = arith.constant 1 : index
    %c33_293 = arith.constant 33 : index
    %526 = vector.load %arg1[%c0_291, %c1_292, %c33_293] : memref<1x4x290xf32, #tpu.memory_space<vmem>>, vector<1x1x256xf32>
    %527 = vector.shape_cast %526 : vector<1x1x256xf32> to vector<256xf32>
    %c0_294 = arith.constant 0 : index
    %c16_295 = arith.constant 16 : index
    %528 = memref.load %arg2[%c0_294, %c16_295] : memref<4x36xf32, #tpu.memory_space<smem>>
    %529 = vector.broadcast %528 : f32 to vector<256xf32>
    %530 = arith.mulf %527, %529 : vector<256xf32>
    %531 = arith.addf %513, %530 : vector<256xf32>
    %c1_296 = arith.constant 1 : index
    %c16_297 = arith.constant 16 : index
    %532 = memref.load %arg2[%c1_296, %c16_297] : memref<4x36xf32, #tpu.memory_space<smem>>
    %533 = vector.broadcast %532 : f32 to vector<256xf32>
    %534 = arith.mulf %527, %533 : vector<256xf32>
    %535 = arith.addf %517, %534 : vector<256xf32>
    %c2_298 = arith.constant 2 : index
    %c16_299 = arith.constant 16 : index
    %536 = memref.load %arg2[%c2_298, %c16_299] : memref<4x36xf32, #tpu.memory_space<smem>>
    %537 = vector.broadcast %536 : f32 to vector<256xf32>
    %538 = arith.mulf %527, %537 : vector<256xf32>
    %539 = arith.addf %521, %538 : vector<256xf32>
    %c3_300 = arith.constant 3 : index
    %c16_301 = arith.constant 16 : index
    %540 = memref.load %arg2[%c3_300, %c16_301] : memref<4x36xf32, #tpu.memory_space<smem>>
    %541 = vector.broadcast %540 : f32 to vector<256xf32>
    %542 = arith.mulf %527, %541 : vector<256xf32>
    %543 = arith.addf %525, %542 : vector<256xf32>
    %c0_302 = arith.constant 0 : index
    %c2_303 = arith.constant 2 : index
    %c33_304 = arith.constant 33 : index
    %544 = vector.load %arg1[%c0_302, %c2_303, %c33_304] : memref<1x4x290xf32, #tpu.memory_space<vmem>>, vector<1x1x256xf32>
    %545 = vector.shape_cast %544 : vector<1x1x256xf32> to vector<256xf32>
    %c0_305 = arith.constant 0 : index
    %c25 = arith.constant 25 : index
    %546 = memref.load %arg2[%c0_305, %c25] : memref<4x36xf32, #tpu.memory_space<smem>>
    %547 = vector.broadcast %546 : f32 to vector<256xf32>
    %548 = arith.mulf %545, %547 : vector<256xf32>
    %549 = arith.addf %531, %548 : vector<256xf32>
    %c1_306 = arith.constant 1 : index
    %c25_307 = arith.constant 25 : index
    %550 = memref.load %arg2[%c1_306, %c25_307] : memref<4x36xf32, #tpu.memory_space<smem>>
    %551 = vector.broadcast %550 : f32 to vector<256xf32>
    %552 = arith.mulf %545, %551 : vector<256xf32>
    %553 = arith.addf %535, %552 : vector<256xf32>
    %c2_308 = arith.constant 2 : index
    %c25_309 = arith.constant 25 : index
    %554 = memref.load %arg2[%c2_308, %c25_309] : memref<4x36xf32, #tpu.memory_space<smem>>
    %555 = vector.broadcast %554 : f32 to vector<256xf32>
    %556 = arith.mulf %545, %555 : vector<256xf32>
    %557 = arith.addf %539, %556 : vector<256xf32>
    %c3_310 = arith.constant 3 : index
    %c25_311 = arith.constant 25 : index
    %558 = memref.load %arg2[%c3_310, %c25_311] : memref<4x36xf32, #tpu.memory_space<smem>>
    %559 = vector.broadcast %558 : f32 to vector<256xf32>
    %560 = arith.mulf %545, %559 : vector<256xf32>
    %561 = arith.addf %543, %560 : vector<256xf32>
    %c0_312 = arith.constant 0 : index
    %c3_313 = arith.constant 3 : index
    %c33_314 = arith.constant 33 : index
    %562 = vector.load %arg1[%c0_312, %c3_313, %c33_314] : memref<1x4x290xf32, #tpu.memory_space<vmem>>, vector<1x1x256xf32>
    %563 = vector.shape_cast %562 : vector<1x1x256xf32> to vector<256xf32>
    %c0_315 = arith.constant 0 : index
    %c34 = arith.constant 34 : index
    %564 = memref.load %arg2[%c0_315, %c34] : memref<4x36xf32, #tpu.memory_space<smem>>
    %565 = vector.broadcast %564 : f32 to vector<256xf32>
    %566 = arith.mulf %563, %565 : vector<256xf32>
    %567 = arith.addf %549, %566 : vector<256xf32>
    %c1_316 = arith.constant 1 : index
    %c34_317 = arith.constant 34 : index
    %568 = memref.load %arg2[%c1_316, %c34_317] : memref<4x36xf32, #tpu.memory_space<smem>>
    %569 = vector.broadcast %568 : f32 to vector<256xf32>
    %570 = arith.mulf %563, %569 : vector<256xf32>
    %571 = arith.addf %553, %570 : vector<256xf32>
    %c2_318 = arith.constant 2 : index
    %c34_319 = arith.constant 34 : index
    %572 = memref.load %arg2[%c2_318, %c34_319] : memref<4x36xf32, #tpu.memory_space<smem>>
    %573 = vector.broadcast %572 : f32 to vector<256xf32>
    %574 = arith.mulf %563, %573 : vector<256xf32>
    %575 = arith.addf %557, %574 : vector<256xf32>
    %c3_320 = arith.constant 3 : index
    %c34_321 = arith.constant 34 : index
    %576 = memref.load %arg2[%c3_320, %c34_321] : memref<4x36xf32, #tpu.memory_space<smem>>
    %577 = vector.broadcast %576 : f32 to vector<256xf32>
    %578 = arith.mulf %563, %577 : vector<256xf32>
    %579 = arith.addf %561, %578 : vector<256xf32>
    %c0_322 = arith.constant 0 : index
    %c0_323 = arith.constant 0 : index
    %c34_324 = arith.constant 34 : index
    %580 = vector.load %arg1[%c0_322, %c0_323, %c34_324] : memref<1x4x290xf32, #tpu.memory_space<vmem>>, vector<1x1x256xf32>
    %581 = vector.shape_cast %580 : vector<1x1x256xf32> to vector<256xf32>
    %c0_325 = arith.constant 0 : index
    %c8 = arith.constant 8 : index
    %582 = memref.load %arg2[%c0_325, %c8] : memref<4x36xf32, #tpu.memory_space<smem>>
    %583 = vector.broadcast %582 : f32 to vector<256xf32>
    %584 = arith.mulf %581, %583 : vector<256xf32>
    %585 = arith.addf %567, %584 : vector<256xf32>
    %c1_326 = arith.constant 1 : index
    %c8_327 = arith.constant 8 : index
    %586 = memref.load %arg2[%c1_326, %c8_327] : memref<4x36xf32, #tpu.memory_space<smem>>
    %587 = vector.broadcast %586 : f32 to vector<256xf32>
    %588 = arith.mulf %581, %587 : vector<256xf32>
    %589 = arith.addf %571, %588 : vector<256xf32>
    %c2_328 = arith.constant 2 : index
    %c8_329 = arith.constant 8 : index
    %590 = memref.load %arg2[%c2_328, %c8_329] : memref<4x36xf32, #tpu.memory_space<smem>>
    %591 = vector.broadcast %590 : f32 to vector<256xf32>
    %592 = arith.mulf %581, %591 : vector<256xf32>
    %593 = arith.addf %575, %592 : vector<256xf32>
    %c3_330 = arith.constant 3 : index
    %c8_331 = arith.constant 8 : index
    %594 = memref.load %arg2[%c3_330, %c8_331] : memref<4x36xf32, #tpu.memory_space<smem>>
    %595 = vector.broadcast %594 : f32 to vector<256xf32>
    %596 = arith.mulf %581, %595 : vector<256xf32>
    %597 = arith.addf %579, %596 : vector<256xf32>
    %c0_332 = arith.constant 0 : index
    %c1_333 = arith.constant 1 : index
    %c34_334 = arith.constant 34 : index
    %598 = vector.load %arg1[%c0_332, %c1_333, %c34_334] : memref<1x4x290xf32, #tpu.memory_space<vmem>>, vector<1x1x256xf32>
    %599 = vector.shape_cast %598 : vector<1x1x256xf32> to vector<256xf32>
    %c0_335 = arith.constant 0 : index
    %c17_336 = arith.constant 17 : index
    %600 = memref.load %arg2[%c0_335, %c17_336] : memref<4x36xf32, #tpu.memory_space<smem>>
    %601 = vector.broadcast %600 : f32 to vector<256xf32>
    %602 = arith.mulf %599, %601 : vector<256xf32>
    %603 = arith.addf %585, %602 : vector<256xf32>
    %c1_337 = arith.constant 1 : index
    %c17_338 = arith.constant 17 : index
    %604 = memref.load %arg2[%c1_337, %c17_338] : memref<4x36xf32, #tpu.memory_space<smem>>
    %605 = vector.broadcast %604 : f32 to vector<256xf32>
    %606 = arith.mulf %599, %605 : vector<256xf32>
    %607 = arith.addf %589, %606 : vector<256xf32>
    %c2_339 = arith.constant 2 : index
    %c17_340 = arith.constant 17 : index
    %608 = memref.load %arg2[%c2_339, %c17_340] : memref<4x36xf32, #tpu.memory_space<smem>>
    %609 = vector.broadcast %608 : f32 to vector<256xf32>
    %610 = arith.mulf %599, %609 : vector<256xf32>
    %611 = arith.addf %593, %610 : vector<256xf32>
    %c3_341 = arith.constant 3 : index
    %c17_342 = arith.constant 17 : index
    %612 = memref.load %arg2[%c3_341, %c17_342] : memref<4x36xf32, #tpu.memory_space<smem>>
    %613 = vector.broadcast %612 : f32 to vector<256xf32>
    %614 = arith.mulf %599, %613 : vector<256xf32>
    %615 = arith.addf %597, %614 : vector<256xf32>
    %c0_343 = arith.constant 0 : index
    %c2_344 = arith.constant 2 : index
    %c34_345 = arith.constant 34 : index
    %616 = vector.load %arg1[%c0_343, %c2_344, %c34_345] : memref<1x4x290xf32, #tpu.memory_space<vmem>>, vector<1x1x256xf32>
    %617 = vector.shape_cast %616 : vector<1x1x256xf32> to vector<256xf32>
    %c0_346 = arith.constant 0 : index
    %c26 = arith.constant 26 : index
    %618 = memref.load %arg2[%c0_346, %c26] : memref<4x36xf32, #tpu.memory_space<smem>>
    %619 = vector.broadcast %618 : f32 to vector<256xf32>
    %620 = arith.mulf %617, %619 : vector<256xf32>
    %621 = arith.addf %603, %620 : vector<256xf32>
    %c1_347 = arith.constant 1 : index
    %c26_348 = arith.constant 26 : index
    %622 = memref.load %arg2[%c1_347, %c26_348] : memref<4x36xf32, #tpu.memory_space<smem>>
    %623 = vector.broadcast %622 : f32 to vector<256xf32>
    %624 = arith.mulf %617, %623 : vector<256xf32>
    %625 = arith.addf %607, %624 : vector<256xf32>
    %c2_349 = arith.constant 2 : index
    %c26_350 = arith.constant 26 : index
    %626 = memref.load %arg2[%c2_349, %c26_350] : memref<4x36xf32, #tpu.memory_space<smem>>
    %627 = vector.broadcast %626 : f32 to vector<256xf32>
    %628 = arith.mulf %617, %627 : vector<256xf32>
    %629 = arith.addf %611, %628 : vector<256xf32>
    %c3_351 = arith.constant 3 : index
    %c26_352 = arith.constant 26 : index
    %630 = memref.load %arg2[%c3_351, %c26_352] : memref<4x36xf32, #tpu.memory_space<smem>>
    %631 = vector.broadcast %630 : f32 to vector<256xf32>
    %632 = arith.mulf %617, %631 : vector<256xf32>
    %633 = arith.addf %615, %632 : vector<256xf32>
    %c0_353 = arith.constant 0 : index
    %c3_354 = arith.constant 3 : index
    %c34_355 = arith.constant 34 : index
    %634 = vector.load %arg1[%c0_353, %c3_354, %c34_355] : memref<1x4x290xf32, #tpu.memory_space<vmem>>, vector<1x1x256xf32>
    %635 = vector.shape_cast %634 : vector<1x1x256xf32> to vector<256xf32>
    %c0_356 = arith.constant 0 : index
    %c35 = arith.constant 35 : index
    %636 = memref.load %arg2[%c0_356, %c35] : memref<4x36xf32, #tpu.memory_space<smem>>
    %637 = vector.broadcast %636 : f32 to vector<256xf32>
    %638 = arith.mulf %635, %637 : vector<256xf32>
    %639 = arith.addf %621, %638 : vector<256xf32>
    %c1_357 = arith.constant 1 : index
    %c35_358 = arith.constant 35 : index
    %640 = memref.load %arg2[%c1_357, %c35_358] : memref<4x36xf32, #tpu.memory_space<smem>>
    %641 = vector.broadcast %640 : f32 to vector<256xf32>
    %642 = arith.mulf %635, %641 : vector<256xf32>
    %643 = arith.addf %625, %642 : vector<256xf32>
    %c2_359 = arith.constant 2 : index
    %c35_360 = arith.constant 35 : index
    %644 = memref.load %arg2[%c2_359, %c35_360] : memref<4x36xf32, #tpu.memory_space<smem>>
    %645 = vector.broadcast %644 : f32 to vector<256xf32>
    %646 = arith.mulf %635, %645 : vector<256xf32>
    %647 = arith.addf %629, %646 : vector<256xf32>
    %c3_361 = arith.constant 3 : index
    %c35_362 = arith.constant 35 : index
    %648 = memref.load %arg2[%c3_361, %c35_362] : memref<4x36xf32, #tpu.memory_space<smem>>
    %649 = vector.broadcast %648 : f32 to vector<256xf32>
    %650 = arith.mulf %635, %649 : vector<256xf32>
    %651 = arith.addf %633, %650 : vector<256xf32>
    %c0_363 = arith.constant 0 : index
    %652 = memref.load %arg3[%c0_363] : memref<4xf32, #tpu.memory_space<smem>>
    %653 = vector.broadcast %652 : f32 to vector<256xf32>
    %654 = arith.addf %639, %653 : vector<256xf32>
    %c0_364 = arith.constant 0 : index
    %c0_365 = arith.constant 0 : index
    %c0_366 = arith.constant 0 : index
    %655 = vector.load %arg4[%c0_364, %c0_365, %c0_366] : memref<1x4x256xf32, #tpu.memory_space<vmem>>, vector<1x1x256xf32>
    %656 = vector.shape_cast %655 : vector<1x1x256xf32> to vector<256xf32>
    %657 = vector.shape_cast %654 : vector<256xf32> to vector<1x1x256xf32>
    tpu.vector_store %arg4[%c0_364, %c0_365, %c0_366], %657 {strides = array<i32>} : memref<1x4x256xf32, #tpu.memory_space<vmem>>, vector<1x1x256xf32>,
    %c1_367 = arith.constant 1 : index
    %658 = memref.load %arg3[%c1_367] : memref<4xf32, #tpu.memory_space<smem>>
    %659 = vector.broadcast %658 : f32 to vector<256xf32>
    %660 = arith.addf %643, %659 : vector<256xf32>
    %c0_368 = arith.constant 0 : index
    %c1_369 = arith.constant 1 : index
    %c0_370 = arith.constant 0 : index
    %661 = vector.load %arg4[%c0_368, %c1_369, %c0_370] : memref<1x4x256xf32, #tpu.memory_space<vmem>>, vector<1x1x256xf32>
    %662 = vector.shape_cast %661 : vector<1x1x256xf32> to vector<256xf32>
    %663 = vector.shape_cast %660 : vector<256xf32> to vector<1x1x256xf32>
    tpu.vector_store %arg4[%c0_368, %c1_369, %c0_370], %663 {strides = array<i32>} : memref<1x4x256xf32, #tpu.memory_space<vmem>>, vector<1x1x256xf32>,
    %c2_371 = arith.constant 2 : index
    %664 = memref.load %arg3[%c2_371] : memref<4xf32, #tpu.memory_space<smem>>
    %665 = vector.broadcast %664 : f32 to vector<256xf32>
    %666 = arith.addf %647, %665 : vector<256xf32>
    %c0_372 = arith.constant 0 : index
    %c2_373 = arith.constant 2 : index
    %c0_374 = arith.constant 0 : index
    %667 = vector.load %arg4[%c0_372, %c2_373, %c0_374] : memref<1x4x256xf32, #tpu.memory_space<vmem>>, vector<1x1x256xf32>
    %668 = vector.shape_cast %667 : vector<1x1x256xf32> to vector<256xf32>
    %669 = vector.shape_cast %666 : vector<256xf32> to vector<1x1x256xf32>
    tpu.vector_store %arg4[%c0_372, %c2_373, %c0_374], %669 {strides = array<i32>} : memref<1x4x256xf32, #tpu.memory_space<vmem>>, vector<1x1x256xf32>,
    %c3_375 = arith.constant 3 : index
    %670 = memref.load %arg3[%c3_375] : memref<4xf32, #tpu.memory_space<smem>>
    %671 = vector.broadcast %670 : f32 to vector<256xf32>
    %672 = arith.addf %651, %671 : vector<256xf32>
    %c0_376 = arith.constant 0 : index
    %c3_377 = arith.constant 3 : index
    %c0_378 = arith.constant 0 : index
    %673 = vector.load %arg4[%c0_376, %c3_377, %c0_378] : memref<1x4x256xf32, #tpu.memory_space<vmem>>, vector<1x1x256xf32>
    %674 = vector.shape_cast %673 : vector<1x1x256xf32> to vector<256xf32>
    %675 = vector.shape_cast %672 : vector<256xf32> to vector<1x1x256xf32>
    tpu.vector_store %arg4[%c0_376, %c3_377, %c0_378], %675 {strides = array<i32>} : memref<1x4x256xf32, #tpu.memory_space<vmem>>, vector<1x1x256xf32>,
    return
  }
  func.func @transform_0(%arg0: i32) -> (i32, i32, i32) {
    %c0_i32 = arith.constant 0 : i32
    %c0_i32_0 = arith.constant 0 : i32
    %c0_i32_1 = arith.constant 0 : i32
    return %arg0, %c0_i32, %c0_i32_0 : i32, i32, i32
  }
  func.func @transform_1(%arg0: i32) -> (i32, i32) {
    %c0_i32 = arith.constant 0 : i32
    %c0_i32_0 = arith.constant 0 : i32
    %c0_i32_1 = arith.constant 0 : i32
    return %c0_i32, %c0_i32_0 : i32, i32
  }
  func.func @transform_2(%arg0: i32) -> i32 {
    %c0_i32 = arith.constant 0 : i32
    %c0_i32_0 = arith.constant 0 : i32
    return %c0_i32 : i32
  }
  func.func @transform_3(%arg0: i32) -> (i32, i32, i32) {
    %c0_i32 = arith.constant 0 : i32
    %c0_i32_0 = arith.constant 0 : i32
    %c0_i32_1 = arith.constant 0 : i32
    return %arg0, %c0_i32, %c0_i32_0 : i32, i32, i32
  }
}

</mosaic_0001>

<bundles_post_ra>
// kernel: tpu_custom_call.1
= control target key start
LH: loop header
LB: loop body
LE: loop exit
PB: predicated region body
PF: predicated region fallthrough
CT: control target
= control target key end

     0   :  { %8 = vsyncpa [#allocation3], 0  ;;  %s3185_s0 = inlined_call_operand.hbm [shape: f32[2,4,290], index: 0, kind: input, shape index: {}]   ;;  %s3186_s1 = inlined_call_operand.hbm [shape: f32[4,36], index: 1, kind: input, shape index: {}]   ;;  %s3187_s2 = inlined_call_operand.vmem [shape: f32[4], index: 2, kind: input, shape index: {}]   ;;  %s3188_s3 = inlined_call_operand.hbm [shape: f32[2,4,256], index: 3, kind: output, shape index: {}]  }
   0x1   :  { %10 = vsyncpa [#allocation3 + $0x1], 0 }
   0x2   :  { %11 = vsyncpa [#allocation5], 0 }
   0x3   :  { %12 = vsyncpa [#allocation6], 0 }
   0x4   :  { %13 = vsyncpa [#allocation4], 0 }
   0x5   :  { %15 = vsyncpa [#allocation4 + $0x1], 0  ;;  %s2132_s12 = smov 0   ;;  %s2134_s13 = smov 0  }
   0x6   :  { %s2136_s14 = smov 0   ;;  %s2138_s15 = smov 0  }
   0x7 LB: > { %s2153_s16 = sadd.s32 4294967295, %s2100_s15   ;;  %s1713_s17 = sadd.s32 4294967294, %s2100_s15   ;;  %s2100_s15 = sphi %s2138_s15, %s3200_s15   ;;  %s2096_s14 = sphi %s2136_s14, %s3199_s14   ;;  %s2092_s13 = sphi %s2134_s13, %s3198_s13   ;;  %s2088_s12 = sphi %s2132_s12, %s3197_s12  }
   0x8   : > { %p41_p0 = scmp.ne.s32.totalorder %s2092_s13, %s2088_s12  ;;  %p42_p1 = scmp.eq.s32.totalorder %s2153_s16, 0 }
   0x9   : > { %p107_p2 = scmp.eq.s32.totalorder %s2153_s16, 1  ;;  %p113_p3 = scmp.eq.s32.totalorder %s1713_s17, 1 }
   0xa   : > { %p2162_p4 = por %p42_p1, %p41_p0  ;;  %p1714_p5 = scmp.ge.s32.totalorder %s2100_s15, 1 }
   0xb   : > { %p2167_p6 = por %p113_p3, %p41_p0  ;;  %p120_p7 = scmp.lt.s32.totalorder %s2100_s15, 3 }
   0xc   : > { %s132_s22 = sshll.u32 %s3186_s1, 4  ;;  %s142_s26 = sshll.u32 %s3187_s2, 4  ;;  %s133_s22 = int_to_ptr.hbm [resolvable:$true] %s132_s22  ;;  %s143_s26 = int_to_ptr.vmem [resolvable:$true] %s142_s26 }
   0xd   : > { %p2175_p8 = pnand %p1714_p5, %p120_p7  ;;  %s2188_s27 = sadd.s32 1, %s2100_s15  }
   0xe   : > { %s25_s28 = ssub.s32 %s2100_s15, %s2188_s27  ;;  %s2102_s29 = smov [#allocation7]  }
   0xf   : > { %p1899_p10 = pneg %p2175_p8  ;;  %s2103_s30 = smov [#allocation8]  }
  0x10   : > { %p26_p12 = scmp.eq.s32.totalorder %s25_s28, 0  ;;  %s28_s4 = sadd.s32 1, %s2096_s14 }
  0x11   : > { %p1900_p11 = pnand %p1899_p10, %p42_p1  ;;  %p35_p13 = scmp.ne.s32.totalorder %s2096_s14, %s2092_s13 }
  0x12   : > { %p36_p0 = scmp.eq.s32.totalorder %s2100_s15, 0  ;;  %p1916_p7 = scmp.lt.s32.totalorder %s2100_s15, 2 }
  0x13   : > { %1902 = dma.hbm_to_smem (!%p1900_p11), %s133_s22, 64, %s2102_s29, [#allocation5]  }
  0x14   : > { %1905 = dma.vmem_to_smem (!%p1900_p11), %s143_s26, 16, %s2103_s30, [#allocation6]  }
  0x15   : > { %s2197_s5 = scalar_select %p26_p12, %s2096_s14, %s28_s4  }
  0x16   : > { %p37_p3 = por %p36_p0, %p35_p13  ;;  %p2201_p5 = por %p107_p2, %p35_p13 }
  0x17   : > { %s153_s7 = sand.u32 1, %s2096_s14   ;;  %s1885_s9 = smul.u32 12, %s2100_s15 }
  0x18   : > { %s1884_s8 = smul.u32 12, %s153_s7  ;;  %p2208_p10 = pnand %p1916_p7, %p37_p3 }
  0x19   : > { %s162_s20 = scalar_lea.hbm %s3185_s0, %s1885_s9  ;;  %s154_s25 = scalar_lea.sflag [#allocation3], %s153_s7 }
  0x1a   : > { %s157_s21 = scalar_lea.vmem [#allocation2], %s1884_s8  ;;  %s164_s24 = sshll.u32 %s162_s20, 4  ;;  %s165_s24 = int_to_ptr.hbm [resolvable:$true] %s164_s24 }
  0x1b   : > { %s166_s22 = sshll.u32 %s157_s21, 4  ;;  %s1996_s26 = sshra.s32 %s165_s24, 4  ;;  %s167_s22 = int_to_ptr.vmem [resolvable:$true] %s166_s22  ;;  %s1997_s26 = int_to_ptr.hbm [resolvable:$true] %s1996_s26 }
  0x1c   : > { %s1998_s28 = scalar_lea.hbm %s1997_s26, 12  ;;  %p2000_p11 = pneg %p2208_p10 }
  0x1d   : > { %p1999_p2 = scmp.ne.s32.totalorder %s1997_s26, %s1998_s28  ;;  %s2003_s4 = scalar_lea.hbm %s3185_s0, 24 }
  0x1e   : > { %p2004_p0 = scmp.lt.s32.totalorder %s1997_s26, %s3185_s0  ;;  %p2005_p3 = scmp.lt.s32.totalorder %s2003_s4, %s1998_s28 }
  0x1f   : > { %p2001_p12 = pnand %p2000_p11, %p1999_p2 }
  0x20   : > { %p2006_p7 = por %p2005_p3, %p2004_p0 }
  0x21   : > { %p2002_p13 = pneg %p2001_p12 }
  0x23   : > { %p2007_p9 = pnand %p2006_p7, %p2002_p13 }
  0x25   : > { %2010 = shalt.err (!%p2007_p9)
}
  0x26   : > { %1909 = dma.hbm_to_vmem [thread:$0]  (!%p2208_p10), %s165_s24, 192, %s167_s22, %s154_s25  }
  0x27   : > { %175 = sbr.rel (%p2175_p8) target bundleno = 522 (0x20a), region = 32  ;;  %s2228_s7 = sand.u32 (!%p2175_p8), 1, %s2092_s13  }
  0x28   : > { %s1886_s8 = smul.u32 (!%p2175_p8), 12, %s2228_s7  ;;  %s178_s17 = scalar_lea.sflag (!%p2175_p8), [#allocation3], %s2228_s7 }
  0x2a   : > { %s2232_s20 = scalar_lea.vmem (!%p2175_p8), [#allocation2], %s1886_s8 }
  0x2c   : > { %2071 = dma.done.wait (%p2162_p4), %s178_s17, 192  }
  0x2d   : > { %2073 = vsyncadd (%p2162_p4), %s178_s17, 4294967104 }
  0x2e   : > { %2075 = dma.done.wait (%p42_p1), [#allocation5], 64  }
  0x2f   : > { %2077 = vsyncadd (%p42_p1), [#allocation5], 4294967232 }
  0x30   : > { %2079 = dma.done.wait (%p42_p1), [#allocation6], 16  }
  0x31   : > { %2081 = vsyncadd (%p42_p1), [#allocation6], 4294967280 }
  0x32   : > { %197 = sfence }
  0x33   : > { %s1743_s23 = sld [smem:[#allocation7 + $0x101]]  ;;  %v2247_v0 = vld [vmem:[%s2232_s20] ss:$4 sm:$0x7]  ;;  %s2104_s25 = smov 127   ;;  %vm295_vm0 = vcmask 1039360  }
  0x34   : > { %s1741_s10 = sld [smem:[#allocation7 + $0x1]]  ;;  %v2252_v5 = vld [vmem:[%s2232_s20 + $0x1] ss:$4 sm:$0x7]  ;;  %vm459_vm1 = vcmask 1031168   ;;  %vm620_vm2 = vcmask 916480  }
  0x35   : > { %s1744_s21 = sld [smem:[#allocation7 + $0x181]]  ;;  %v2267_v19 = vld [vmem:[%s2232_s20 + $0x2] ss:$4 sm:$0x7]  ;;  %vm781_vm3 = vcmask 908288   ;;  %vm942_vm4 = vcmask 900096  }
  0x36   : > { %s1742_s18 = sld [smem:[#allocation7 + $0x81]]  ;;  %v2279_v27 = vld [vmem:[%s2232_s20 + $0x3] ss:$4 sm:$0x7]  ;;  %vm1103_vm5 = vcmask 785408   ;;  %vm1264_vm6 = vcmask 777216  }
  0x37   : > { %s1746_s22 = sld [smem:[#allocation7 + $0xa]]  ;;  %vm1425_vm7 = vcmask 769024  }
  0x38   : > { %s1747_s24 = sld [smem:[#allocation7 + $0x8a]] }
  0x39   : > { %v310_v1 = vstv %s1743_s23  ;;  %s1749_s26 = sld [smem:[#allocation7 + $0x18a]] }
  0x3a   : > { %v311_v2 = vmul.f32 %v310_v1, %v2247_v0  ;;  %v289_v3 = vstv %s1741_s10  ;;  %s1748_s28 = sld [smem:[#allocation7 + $0x10a]] }
  0x3b   : > { %v290_v4 = vmul.f32 %v289_v3, %v2247_v0  ;;  %v320_v6 = vstv %s1744_s21  ;;  %s1751_s29 = sld [smem:[#allocation7 + $0x13]] }
  0x3c   : > { %313 = vrot.lane.b32.xlu1 %v311_v2, %s2104_s25  ;;  %v300_v8 = vstv %s1742_s18  ;;  %v321_v10 = vmul.f32 %v320_v6, %v2247_v0  ;;  %s1753_s30 = sld [smem:[#allocation7 + $0x113]] }
  0x3d   : > { %292 = vrot.lane.b32.xlu0 %v290_v4, %s2104_s25  ;;  %v331_v7 = vstv %s1746_s22  ;;  %v301_v11 = vmul.f32 %v300_v8, %v2247_v0  ;;  %s1752_s4 = sld [smem:[#allocation7 + $0x93]] }
  0x3e   : > { %v332_v9 = vmul.f32 %v2252_v5, %v331_v7  ;;  %v341_v12 = vstv %s1747_s24  ;;  %s1754_s11 = sld [smem:[#allocation7 + $0x193]] }
  0x3f   : > { %v342_v13 = vmul.f32 %v2252_v5, %v341_v12  ;;  %v361_v14 = vstv %s1749_s26  ;;  %s1757_s9 = sld [smem:[#allocation7 + $0x9c]]  ;;  %s2105_s26 = smov 126  }
  0x40   : > { %334 = vrot.lane.b32.xlu2 %v332_v9, %s2104_s25  ;;  %v351_v15 = vstv %s1748_s28  ;;  %v362_v16 = vmul.f32 %v2252_v5, %v361_v14  ;;  %s1756_s8 = sld [smem:[#allocation7 + $0x1c]] }
  0x41   : > { %v352_v17 = vmul.f32 %v2252_v5, %v351_v15  ;;  %v372_v18 = vstv %s1751_s29  ;;  %s1758_s17 = sld [smem:[#allocation7 + $0x11c]] }
  0x42   : > { %v373_v20 = vmul.f32 %v2267_v19, %v372_v18  ;;  %v392_v21 = vstv %s1753_s30  ;;  %s1760_s23 = sld [smem:[#allocation7 + $0x2]] }
  0x43   : > { %v382_v22 = vstv %s1752_s4  ;;  %v393_v23 = vmul.f32 %v2267_v19, %v392_v21  ;;  %s1759_s10 = sld [smem:[#allocation7 + $0x19c]] }
  0x44   : > { %323 = vrot.lane.b32.xlu1 %v321_v10, %s2104_s25  ;;  %v383_v24 = vmul.f32 %v2267_v19, %v382_v22  ;;  %v402_v25 = vstv %s1754_s11  ;;  %s1761_s21 = sld [smem:[#allocation7 + $0x82]] }
  0x45   : > { %303 = vrot.lane.b32.xlu0 %v301_v11, %s2104_s25  ;;  %v403_v26 = vmul.f32 %v2267_v19, %v402_v25  ;;  %v423_v28 = vstv %s1757_s9  ;;  %s1763_s18 = sld [smem:[#allocation7 + $0x182]] }
  0x46   : > { %v413_v29 = vstv %s1756_s8  ;;  %v424_v30 = vmul.f32 %v2279_v27, %v423_v28  ;;  %s1762_s22 = sld [smem:[#allocation7 + $0x102]] }
  0x47   : > { %v414_v31 = vmul.f32 %v2279_v27, %v413_v29  ;;  %v433_v32 = vstv %s1758_s17  ;;  %s1764_s24 = sld [smem:[#allocation7 + $0xb]] }
  0x48   : > { %344 = vrot.lane.b32.xlu2 %v342_v13, %s2104_s25  ;;  %v434_v33 = vmul.f32 %v2279_v27, %v433_v32  ;;  %v453_v34 = vstv %s1760_s23  ;;  %s1766_s28 = sld [smem:[#allocation7 + $0x10b]] }
  0x49   : > { %v443_v35 = vstv %s1759_s10  ;;  %v454_v36 = vmul.f32 %v453_v34, %v2247_v0  ;;  %s1765_s29 = sld [smem:[#allocation7 + $0x8b]] }
  0x4a   : > { %v444_v37 = vmul.f32 %v2279_v27, %v443_v35  ;;  %v464_v38 = vstv %s1761_s21  ;;  %s1767_s30 = sld [smem:[#allocation7 + $0x18b]]  ;;  %v2385_v35 = vld [vmem:[%s2232_s20 + $0x2] ss:$4 sm:$0x3] }
  0x4b   : > { %v465_v39 = vmul.f32 %v464_v38, %v2247_v0  ;;  %v484_v40 = vstv %s1763_s18  ;;  %s1768_s4 = sld [smem:[#allocation7 + $0x14]] }
  0x4c   : > { %364 = vrot.lane.b32.xlu1 %v362_v16, %s2104_s25  ;;  %v474_v41 = vstv %s1762_s22  ;;  %v485_v42 = vmul.f32 %v484_v40, %v2247_v0  ;;  %s1770_s11 = sld [smem:[#allocation7 + $0x114]]  ;;  %v2399_v40 = vld [vmem:[%s2232_s20 + $0x3] ss:$4 sm:$0x3] }
  0x4d   : > { %354 = vrot.lane.b32.xlu0 %v352_v17, %s2104_s25  ;;  %v475_v43 = vmul.f32 %v474_v41, %v2247_v0  ;;  %v494_v44 = vstv %s1764_s24  ;;  %s1772_s9 = sld [smem:[#allocation7 + $0x1d]] }
  0x4e   : > { %v495_v45 = vmul.f32 %v2252_v5, %v494_v44  ;;  %v514_v46 = vstv %s1766_s28  ;;  %s1771_s8 = sld [smem:[#allocation7 + $0x194]] }
  0x4f   : > { %v504_v47 = vstv %s1765_s29  ;;  %v515_v48 = vmul.f32 %v2252_v5, %v514_v46  ;;  %s1773_s17 = sld [smem:[#allocation7 + $0x9d]] }
  0x50   : > { %375 = vrot.lane.b32.xlu2 %v373_v20, %s2104_s25  ;;  %v505_v49 = vmul.f32 %v2252_v5, %v504_v47  ;;  %v524_v50 = vstv %s1767_s30  ;;  %s1775_s23 = sld [smem:[#allocation7 + $0x19d]]  ;;  %s2106_s30 = smov 112  }
  0x51   : > { %v525_v51 = vmul.f32 %v2252_v5, %v524_v50  ;;  %v534_v53 = vstv %s1768_s4  ;;  %s1774_s10 = sld [smem:[#allocation7 + $0x11d]] }
  0x52   : > { %v535_v55 = vmul.f32 %v2267_v19, %v534_v53  ;;  %v554_v56 = vstv %s1770_s11  ;;  %s1776_s21 = sld [smem:[#allocation7 + $0x3]] }
  0x53   : > { %v555_v57 = vmul.f32 %v2267_v19, %v554_v56  ;;  %v574_v58 = vstv %s1772_s9  ;;  %s1778_s18 = sld [smem:[#allocation7 + $0x103]] }
  0x54   : > { %395 = vrot.lane.b32.xlu1 %v393_v23, %s2104_s25  ;;  %v564_v59 = vstv %s1771_s8  ;;  %v575_v60 = vmul.f32 %v2279_v27, %v574_v58  ;;  %s1777_s22 = sld [smem:[#allocation7 + $0x83]] }
  0x55   : > { %385 = vrot.lane.b32.xlu0 %v383_v24, %s2104_s25  ;;  %v565_v61 = vmul.f32 %v2267_v19, %v564_v59  ;;  %v584_v62 = vstv %s1773_s17  ;;  %s1779_s24 = sld [smem:[#allocation7 + $0x183]]  ;;  %v2359_v24 = vld [vmem:[%s2232_s20] ss:$4 sm:$0x3] }
  0x56   : > { %v585_v63 = vmul.f32 %v2279_v27, %v584_v62  ;;  %v604_v1 = vstv %s1775_s23  ;;  %s1781_s28 = sld [smem:[#allocation7 + $0x8c]] }
  0x57   : > { %v594_v2 = vstv %s1774_s10  ;;  %v605_v3 = vmul.f32 %v2279_v27, %v604_v1  ;;  %s1780_s29 = sld [smem:[#allocation7 + $0xc]] }
  0x58   : > { %405 = vrot.lane.b32.xlu2 %v403_v26, %s2104_s25  ;;  %v595_v4 = vmul.f32 %v2279_v27, %v594_v2  ;;  %v614_v6 = vstv %s1776_s21  ;;  %s1784_s4 = sld [smem:[#allocation7 + $0x15]]  ;;  %v2366_v26 = vld [vmem:[%s2232_s20 + $0x1] ss:$4 sm:$0x3] }
  0x59   : > { %v615_v7 = vmul.f32 %v614_v6, %v2247_v0  ;;  %v635_v8 = vstv %s1778_s18  ;;  %s2327_s11 = sld [smem:[#allocation7 + $0x18c]] }
  0x5a   : > { %v625_v9 = vstv %s1777_s22  ;;  %v636_v10 = vmul.f32 %v635_v8, %v2247_v0  ;;  %s2333_s9 = sld [smem:[#allocation7 + $0x115]] }
  0x5b   : > { %v626_v11 = vmul.f32 %v625_v9, %v2247_v0  ;;  %v645_v12 = vstv %s1779_s24  ;;  %s2335_s8 = sld [smem:[#allocation7]] }
  0x5c   : > { %426 = vrot.lane.b32.xlu1 %v424_v30, %s2104_s25  ;;  %v646_v13 = vmul.f32 %v645_v12, %v2247_v0  ;;  %v665_v14 = vstv %s1781_s28  ;;  %s1727_s17 = sld [smem:[#allocation7 + $0x9]] }
  0x5d   : > { %416 = vrot.lane.b32.xlu0 %v414_v31, %s2104_s25  ;;  %v655_v15 = vstv %s1780_s29  ;;  %v666_v16 = vmul.f32 %v2252_v5, %v665_v14  ;;  %s2340_s23 = sld [smem:[#allocation7 + $0x95]] }
  0x5e   : > { %v656_v17 = vmul.f32 %v2252_v5, %v655_v15  ;;  %s2344_s10 = sld [smem:[#allocation7 + $0x100]]  ;;  %v695_v22 = vstv %s1784_s4 }
  0x5f   : > { %s2346_s21 = sld [smem:[#allocation7 + $0x109]]  ;;  %v685_v23 = vstv %s2327_s11  ;;  %v696_v25 = vmul.f32 %v2267_v19, %v695_v22 }
  0x60   : > { %436 = vrot.lane.b32.xlu2 %v434_v33, %s2104_s25  ;;  %s2350_s18 = sld [smem:[#allocation7 + $0x12]]  ;;  %v686_v30 = vmul.f32 %v2252_v5, %v685_v23 }
  0x61   : > { %s2353_s22 = sld [smem:[#allocation7 + $0x112]]  ;;  %v218_v28 = vstv %s2335_s8 }
  0x62   : > { %s2356_s24 = sld [smem:[#allocation7 + $0x1b]]  ;;  %v236_v29 = vstv %s1727_s17  ;;  %v219_v33 = vmul.f32 %v218_v28, %v2359_v24 }
  0x63   : > { %s2361_s28 = sld [smem:[#allocation7 + $0x80]]  ;;  %v705_v31 = vstv %s2340_s23  ;;  %v237_v34 = vmul.f32 %v2366_v26, %v236_v29 }
  0x64   : > { %456 = vrot.lane.b32.xlu1 %v454_v36, %s2105_s26  ;;  %s2369_s29 = sld [smem:[#allocation7 + $0x89]] }
  0x65   : > { %446 = vrot.lane.b32.xlu0 %v444_v37, %s2104_s25  ;;  %s1769_s25 = sld [smem:[#allocation7 + $0x94]]  ;;  %v706_v37 = vmul.f32 %v2267_v19, %v705_v31  ;;  %v238_v41 = vadd.f32 %v237_v34, %v219_v33  ;;  %v244_v50 = vstv %s2346_s21 }
  0x66   : > { %s2377_s4 = sld [smem:[#allocation7 + $0x11e]]  ;;  %v254_v36 = vstv %s2350_s18 }
  0x67   : > { %s2381_s11 = sld [smem:[#allocation7 + $0x180]]  ;;  %v262_v2 = vstv %s2353_s22 }
  0x68   : > { %467 = vrot.lane.b32.xlu2 %v465_v39, %s2105_s26  ;;  %s2389_s8 = sld [smem:[#allocation7 + $0x92]]  ;;  %v715_v39 = vstv %s2333_s9  ;;  %v263_v22 = vmul.f32 %v2385_v35, %v262_v2 }
  0x69   : > { %s2393_s17 = sld [smem:[#allocation7 + $0x189]]  ;;  %v716_v47 = vmul.f32 %v2267_v19, %v715_v39 }
  0x6a   : > { %s2396_s23 = sld [smem:[#allocation7 + $0x9e]]  ;;  %v240_v46 = vstv %s2369_s29 }
  0x6b   : > { %v544_v52 = vstv %s1769_s25  ;;  %s1782_s25 = sld [smem:[#allocation7 + $0x10c]]  ;;  %v241_v56 = vmul.f32 %v2366_v26, %v240_v46 }
  0x6c   : > { %487 = vrot.lane.b32.xlu1 %v485_v42, %s2105_s26  ;;  %v545_v54 = vmul.f32 %v2267_v19, %v544_v52  ;;  %v255_v42 = vmul.f32 %v2385_v35, %v254_v36  ;;  %s2403_s18 = sld [smem:[#allocation7 + $0x192]] }
  0x6d   : > { %477 = vrot.lane.b32.xlu0 %v475_v43, %s2105_s26  ;;  %v272_v43 = vstv %s2356_s24  ;;  %s2413_s9 = sld [smem:[#allocation7 + $0x19e]] }
  0x6e   : > { %s2418_s24 = sld [smem:[#allocation7 + $0x11b]]  ;;  %v256_v53 = vadd.f32 %v255_v42, %v238_v41  ;;  %v258_v58 = vstv %s2389_s8 }
  0x6f   : > { %v248_v62 = vstv %s2393_s17  ;;  %s2441_s21 = sld [smem:[#allocation7 + $0x4]] }
  0x70   : > { %497 = vrot.lane.b32.xlu2 %v495_v45, %s2105_s26  ;;  %v222_v45 = vstv %s2361_s28  ;;  %s2425_s28 = sld [smem:[#allocation7 + $0x19b]] }
  0x71   : > { %v675_v18 = vstv %s1782_s25  ;;  %s2373_s25 = sld [smem:[#allocation7 + $0x1e]] }
  0x72   : > { %v676_v21 = vmul.f32 %v2252_v5, %v675_v18  ;;  %s2451_s22 = sld [smem:[#allocation7 + $0x104]] }
  0x73   : > { %s2464_s29 = sld [smem:[#allocation7 + $0xd]] }
  0x74   : > { %517 = vrot.lane.b32.xlu1 %v515_v48, %s2105_s26  ;;  %s2499_s8 = sld [smem:[#allocation7 + $0x10d]] }
  0x75   : > { %507 = vrot.lane.b32.xlu0 %v505_v49, %s2105_s26  ;;  %v226_v49 = vstv %s2344_s10  ;;  %s2433_s10 = sld [smem:[#allocation7 + $0x84]]  ;;  %v775_v41 = vstv %s2441_s21 }
  0x76   : > { %v284_v36 = vstv %s2425_s28  ;;  %s2508_s17 = sld [smem:[#allocation7 + $0x16]] }
  0x77   : > { %v735_v48 = vstv %s2373_s25  ;;  %s2470_s25 = sld [smem:[#allocation7 + $0x184]] }
  0x78   : > { %527 = vrot.lane.b32.xlu2 %v525_v51, %s2105_s26  ;;  %v273_v51 = vmul.f32 %v2399_v40, %v272_v43  ;;  %v736_v59 = vmul.f32 %v2279_v27, %v735_v48  ;;  %s2548_s28 = sld [smem:[#allocation7 + $0x11f]] }
  0x79   : > { %s2561_s21 = sld [smem:[#allocation7 + $0x19f]] }
  0x7c   : > { %547 = vrot.lane.b32.xlu1 %v545_v54, %s2105_s26  ;;  %v755_v54 = vstv %s2377_s4  ;;  %s2482_s4 = sld [smem:[#allocation7 + $0x8d]] }
  0x7d   : > { %537 = vrot.lane.b32.xlu0 %v535_v55, %s2105_s26  ;;  %v223_v55 = vmul.f32 %v222_v45, %v2359_v24 }
  0x7f   : > { %v242_v9 = vadd.f32 %v241_v56, %v223_v55 }
  0x80   : > { %557 = vrot.lane.b32.xlu2 %v555_v57, %s2105_s26  ;;  %v230_v57 = vstv %s2381_s11  ;;  %s2107_s11 = smov 111  }
  0x81   : > { %v231_v8 = vmul.f32 %v230_v57, %v2359_v24 }
  0x84   : > { %577 = vrot.lane.b32.xlu1 %v575_v60, %s2105_s26  ;;  %v227_v60 = vmul.f32 %v226_v49, %v2359_v24 }
  0x85   : > { %567 = vrot.lane.b32.xlu0 %v565_v61, %s2105_s26  ;;  %v245_v61 = vmul.f32 %v2366_v26, %v244_v50 }
  0x88   : > { %587 = vrot.lane.b32.xlu2 %v585_v63, %s2105_s26 }
  0x8c   : > { %607 = vrot.lane.b32.xlu1 %v605_v3, %s2105_s26  ;;  %v756_v3 = vmul.f32 %v2279_v27, %v755_v54 }
  0x8d   : > { %597 = vrot.lane.b32.xlu0 %v595_v4, %s2105_s26  ;;  %s2331_s26 = sld [smem:[#allocation7 + $0x195]]  ;;  %v745_v4 = vstv %s2396_s23 }
  0x8e   : > { %v746_v15 = vmul.f32 %v2279_v27, %v745_v4  ;;  %s2517_s23 = sld [smem:[#allocation7 + $0x116]] }
  0x90   : > { %617 = vrot.lane.b32.xlu2 %v615_v7, %s2106_s30  ;;  %v274_v7 = vadd.f32 %v273_v51, %v256_v53  ;;  %v776_v51 = vmul.f32 %v775_v41, %v2247_v0 }
  0x93   : > { %v725_v38 = vstv %s2331_s26  ;;  %s2409_s26 = sld [smem:[#allocation7 + $0x9b]] }
  0x94   : > { %638 = vrot.lane.b32.xlu1 %v636_v10, %s2106_s30  ;;  %v726_v44 = vmul.f32 %v2267_v19, %v725_v38  ;;  %v259_v10 = vmul.f32 %v2385_v35, %v258_v58 }
  0x95   : > { %628 = vrot.lane.b32.xlu0 %v626_v11, %s2106_s30 }
  0x96   : > { %v260_v28 = vadd.f32 %v259_v10, %v242_v9 }
  0x98   : > { %648 = vrot.lane.b32.xlu2 %v646_v13, %s2106_s30  ;;  %v249_v13 = vmul.f32 %v2366_v26, %v248_v62 }
  0x99   : > { %v276_v14 = vstv %s2409_s26  ;;  %s2528_s26 = sld [smem:[#allocation7 + $0x196]] }
  0x9a   : > { %v2342_v20 = vpop.permute.xlu2 %334  ;;  %v277_v29 = vmul.f32 %v2399_v40, %v276_v14 }
  0x9b   : > { %v336_v63 = vrot.slane %v2342_v20, 1 }
  0x9c   : > { %668 = vrot.lane.b32.xlu1 %v666_v16, %s2106_s30  ;;  %v266_v16 = vstv %s2403_s18  ;;  %v278_v45 = vadd.f32 %v277_v29, %v260_v28  ;;  %s2520_s18 = sld [smem:[#allocation7 + $0x96]] }
  0x9d   : > { %658 = vrot.lane.b32.xlu0 %v656_v17, %s2106_s30  ;;  %v765_v17 = vstv %s2413_s9  ;;  %v337_v18 = vsel %vm295_vm0, %v2342_v20, %v336_v63  ;;  %v250_v20 = vadd.f32 %v249_v13, %v231_v8  ;;  %v267_v31 = vmul.f32 %v2385_v35, %v266_v16  ;;  %s2537_s9 = sld [smem:[#allocation7 + $0x9f]] }
  0x9e   : > { %v766_v33 = vmul.f32 %v2279_v27, %v765_v17  ;;  %v806_v63 = vstv %s2470_s25  ;;  %v826_v13 = vstv %s2482_s4  ;;  %s2582_s25 = sld [smem:[#allocation7 + $0x105]] }
  0x9f   : > { %v268_v46 = vadd.f32 %v267_v31, %v250_v20  ;;  %v807_v10 = vmul.f32 %v806_v63, %v2247_v0  ;;  %s2590_s4 = sld [smem:[#allocation7 + $0xe]] }
  0xa0   : > { %678 = vrot.lane.b32.xlu2 %v676_v21, %s2106_s30  ;;  %v246_v21 = vadd.f32 %v245_v61, %v227_v60 }
  0xa2   : > { %v2375_v32 = vpop.permute.xlu2 %344  ;;  %v264_v42 = vadd.f32 %v263_v22, %v246_v21  ;;  %v827_v21 = vmul.f32 %v2252_v5, %v826_v13 }
  0xa3   : > { %v346_v38 = vrot.slane %v2375_v32, 1 }
  0xa4   : > { %698 = vrot.lane.b32.xlu1 %v696_v25, %s2106_s30  ;;  %v280_v25 = vstv %s2418_s24  ;;  %s2540_s24 = sld [smem:[#allocation7 + $0x1f]] }
  0xa5   : > { %688 = vrot.lane.b32.xlu0 %v686_v30, %s2106_s30  ;;  %v281_v43 = vmul.f32 %v2399_v40, %v280_v25  ;;  %v347_v53 = vsel %vm295_vm0, %v2375_v32, %v346_v38  ;;  %v836_v25 = vstv %s2499_s8  ;;  %s2600_s8 = sld [smem:[#allocation7 + $0x10e]] }
  0xa7   : > { %v282_v57 = vadd.f32 %v281_v43, %v264_v42 }
  0xa8   : > { %708 = vrot.lane.b32.xlu2 %v706_v37, %s2106_s30  ;;  %v786_v37 = vstv %s2433_s10  ;;  %s2558_s10 = sld [smem:[#allocation7 + $0x5]] }
  0xa9   : > { %v787_v49 = vmul.f32 %v786_v37, %v2247_v0 }
  0xaa   : > { %v376_v52 = vpop.permute.xlu2 %375 }
  0xab   : > { %v377_v12 = vrot.slane %v376_v52, 1 }
  0xac   : > { %728 = vrot.lane.b32.xlu1 %v726_v44, %s2106_s30 }
  0xad   : > { %718 = vrot.lane.b32.xlu0 %v716_v47, %s2106_s30  ;;  %v378_v30 = vsel %vm295_vm0, %v376_v52, %v377_v12  ;;  %v285_v47 = vmul.f32 %v2399_v40, %v284_v36  ;;  %v796_v52 = vstv %s2451_s22  ;;  %s2569_s22 = sld [smem:[#allocation7 + $0x85]] }
  0xae   : > { %v2436_v1 = vpop.permute.xlu1 %313  ;;  %v797_v60 = vmul.f32 %v796_v52, %v2247_v0 }
  0xaf   : > { %v293_v6 = vpop.permute.xlu0 %292  ;;  %v315_v54 = vrot.slane %v2436_v1, 1  ;;  %v286_v58 = vadd.f32 %v285_v47, %v268_v46  ;;  %v866_v46 = vstv %s2520_s18  ;;  %s2624_s18 = sld [smem:[#allocation7 + $0x17]] }
  0xb0   : > { %v294_v11 = vrot.slane %v293_v6, 1  ;;  %738 = vrot.lane.b32.xlu2 %v736_v59, %s2106_s30  ;;  %v816_v59 = vstv %s2464_s29  ;;  %s2579_s29 = sld [smem:[#allocation7 + $0x185]] }
  0xb1   : > { %v316_v2 = vsel %vm295_vm0, %v2436_v1, %v315_v54  ;;  %v817_v9 = vmul.f32 %v2252_v5, %v816_v59  ;;  %v886_v54 = vstv %s2528_s26  ;;  %s2632_s26 = sld [smem:[#allocation7 + $0x117]] }
  0xb2   : > { %v296_v23 = vsel %vm295_vm0, %v293_v6, %v294_v11  ;;  %v2457_v24 = vpop.permute.xlu2 %405  ;;  %v318_v11 = vadd.f32 %v316_v2, %v282_v57  ;;  %v887_v59 = vmul.f32 %v2267_v19, %v886_v54 }
  0xb3   : > { %v298_v26 = vadd.f32 %v296_v23, %v274_v7  ;;  %v407_v32 = vrot.slane %v2457_v24, 1 }
  0xb4   : > { %758 = vrot.lane.b32.xlu1 %v756_v3, %s2106_s30 }
  0xb5   : > { %v339_v34 = vadd.f32 %v337_v18, %v298_v26  ;;  %748 = vrot.lane.b32.xlu0 %v746_v15, %s2106_s30  ;;  %v408_v1 = vsel %vm295_vm0, %v2457_v24, %v407_v32  ;;  %v896_v32 = vstv %s2540_s24  ;;  %s2645_s24 = sld [smem:[#allocation7 + $0x197]] }
  0xb6   : > { %v324_v39 = vpop.permute.xlu1 %323 }
  0xb7   : > { %v2475_v35 = vadd.f32 %v378_v30, %v339_v34  ;;  %v304_v44 = vpop.permute.xlu0 %303  ;;  %v325_v50 = vrot.slane %v324_v39, 1  ;;  %v856_v34 = vstv %s2508_s17  ;;  %s2603_s17 = sld [smem:[#allocation7 + $0x8e]] }
  0xb8   : > { %v305_v48 = vrot.slane %v304_v44, 1  ;;  %768 = vrot.lane.b32.xlu2 %v766_v33, %s2106_s30  ;;  %s2495_s30 = sld [smem:[#allocation7 + $0x18d]]  ;;  %v837_v33 = vmul.f32 %v2252_v5, %v836_v25  ;;  %v857_v42 = vmul.f32 %v2267_v19, %v856_v34 }
  0xb9   : > { %v326_v61 = vsel %vm295_vm0, %v324_v39, %v325_v50 }
  0xba   : > { %v306_v40 = vsel %vm295_vm0, %v304_v44, %v305_v48  ;;  %v437_v55 = vpop.permute.xlu2 %436  ;;  %v328_v7 = vadd.f32 %v326_v61, %v286_v58  ;;  %v876_v44 = vstv %s2517_s23  ;;  %v906_v61 = vstv %s2537_s9  ;;  %s2621_s23 = sld [smem:[#allocation7 + $0x97]] }
  0xbb   : > { %v308_v56 = vadd.f32 %v306_v40, %v278_v45  ;;  %v438_v22 = vrot.slane %v437_v55, 1  ;;  %v877_v50 = vmul.f32 %v2267_v19, %v876_v44  ;;  %s2642_s9 = sld [smem:[#allocation7 + $0x20]] }
  0xbc   : > { %789 = vrot.lane.b32.xlu1 %v787_v49, %s2107_s11 }
  0xbd   : > { %v349_v62 = vadd.f32 %v347_v53, %v308_v56  ;;  %778 = vrot.lane.b32.xlu0 %v776_v51, %s2107_s11  ;;  %v439_v31 = vsel %vm295_vm0, %v437_v55, %v438_v22  ;;  %v867_v53 = vmul.f32 %v2267_v19, %v866_v46 }
  0xbe   : > { %v365_v3 = vpop.permute.xlu1 %364  ;;  %v846_v23 = vstv %s2495_s30  ;;  %s2108_s30 = smov 110  }
  0xbf   : > { %v366_v4 = vrot.slane %v365_v3, 1  ;;  %v355_v6 = vpop.permute.xlu0 %354  ;;  %v847_v30 = vmul.f32 %v2252_v5, %v846_v23 }
  0xc0   : > { %v356_v8 = vrot.slane %v355_v6, 1  ;;  %799 = vrot.lane.b32.xlu2 %v797_v60, %s2107_s11 }
  0xc1   : > { %v367_v12 = vsel %vm295_vm0, %v365_v3, %v366_v4  ;;  %v907_v3 = vmul.f32 %v2279_v27, %v906_v61 }
  0xc2   : > { %v369_v14 = vadd.f32 %v367_v12, %v328_v7  ;;  %v357_v15 = vsel %vm295_vm0, %v355_v6, %v356_v8  ;;  %v468_v16 = vpop.permute.xlu2 %467  ;;  %v897_v7 = vmul.f32 %v2279_v27, %v896_v32  ;;  %v916_v8 = vstv %s2548_s28  ;;  %s2653_s28 = sld [smem:[#allocation7 + $0xa0]] }
  0xc3   : > { %v359_v17 = vadd.f32 %v357_v15, %v318_v11  ;;  %v469_v43 = vrot.slane %v468_v16, 1  ;;  %v917_v13 = vmul.f32 %v2279_v27, %v916_v8  ;;  %v936_v15 = vstv %s2558_s10  ;;  %s2663_s10 = sld [smem:[#allocation7 + $0x1a0]] }
  0xc4   : > { %v2511_v18 = vadd.f32 %v408_v1, %v369_v14  ;;  %819 = vrot.lane.b32.xlu1 %v817_v9, %s2107_s11  ;;  %v937_v23 = vmul.f32 %v936_v15, %v2247_v0 }
  0xc5   : > { %809 = vrot.lane.b32.xlu0 %v807_v10, %s2107_s11  ;;  %v470_v52 = vsel %vm459_vm1, %v468_v16, %v469_v43 }
  0xc6   : > { %v396_v24 = vpop.permute.xlu1 %395 }
  0xc7   : > { %v397_v26 = vrot.slane %v396_v24, 1  ;;  %v386_v28 = vpop.permute.xlu0 %385 }
  0xc8   : > { %v387_v29 = vrot.slane %v386_v28, 1  ;;  %829 = vrot.lane.b32.xlu2 %v827_v21, %s2107_s11 }
  0xc9   : > { %v398_v20 = vsel %vm295_vm0, %v396_v24, %v397_v26 }
  0xca   : > { %v400_v36 = vadd.f32 %v398_v20, %v359_v17  ;;  %v388_v37 = vsel %vm295_vm0, %v386_v28, %v387_v29  ;;  %v498_v38 = vpop.permute.xlu2 %497  ;;  %v926_v17 = vstv %s2561_s21  ;;  %v947_v28 = vstv %s2569_s22  ;;  %s2666_s21 = sld [smem:[#allocation7 + $0x120]] }
  0xcb   : > { %v390_v39 = vadd.f32 %v388_v37, %v349_v62  ;;  %v499_v60 = vrot.slane %v498_v38, 1  ;;  %v927_v26 = vmul.f32 %v2279_v27, %v926_v17  ;;  %v948_v34 = vmul.f32 %v947_v28, %v2247_v0  ;;  %s2674_s22 = sld [smem:[#allocation7 + $0x6]] }
  0xcc   : > { %v2531_v41 = vadd.f32 %v439_v31, %v400_v36  ;;  %849 = vrot.lane.b32.xlu1 %v847_v30, %s2107_s11  ;;  %v967_v37 = vstv %s2579_s29  ;;  %v1037_v17 = vstv %s2632_s26  ;;  %v1057_v28 = vstv %s2642_s9  ;;  %s2684_s29 = sld [smem:[#allocation7 + $0x106]] }
  0xcd   : > { %839 = vrot.lane.b32.xlu0 %v837_v33, %s2107_s11  ;;  %v500_v6 = vsel %vm459_vm1, %v498_v38, %v499_v60  ;;  %v968_v44 = vmul.f32 %v967_v37, %v2247_v0  ;;  %s2743_s26 = sld [smem:[#allocation7 + $0x98]] }
  0xce   : > { %v427_v45 = vpop.permute.xlu1 %426  ;;  %s2753_s9 = sld [smem:[#allocation7 + $0x198]] }
  0xcf   : > { %v428_v47 = vrot.slane %v427_v45, 1  ;;  %v417_v48 = vpop.permute.xlu0 %416 }
  0xd0   : > { %v418_v49 = vrot.slane %v417_v48, 1  ;;  %859 = vrot.lane.b32.xlu2 %v857_v42, %s2107_s11 }
  0xd1   : > { %v429_v51 = vsel %vm295_vm0, %v427_v45, %v428_v47 }
  0xd2   : > { %v431_v40 = vadd.f32 %v429_v51, %v390_v39  ;;  %v419_v55 = vsel %vm295_vm0, %v417_v48, %v418_v49  ;;  %v528_v56 = vpop.permute.xlu2 %527  ;;  %v957_v39 = vstv %s2582_s25  ;;  %v977_v48 = vstv %s2590_s4  ;;  %s2687_s25 = sld [smem:[#allocation7 + $0x86]] }
  0xd3   : > { %v421_v57 = vadd.f32 %v419_v55, %v2475_v35  ;;  %v529_v14 = vrot.slane %v528_v56, 1  ;;  %v958_v47 = vmul.f32 %v957_v39, %v2247_v0  ;;  %v978_v54 = vmul.f32 %v2252_v5, %v977_v48  ;;  %s2695_s4 = sld [smem:[#allocation7 + $0x186]] }
  0xd4   : > { %v2552_v58 = vadd.f32 %v470_v52, %v431_v40  ;;  %879 = vrot.lane.b32.xlu1 %v877_v50, %s2107_s11  ;;  %v997_v0 = vstv %s2600_s8  ;;  %v1067_v39 = vstv %s2653_s28  ;;  %s2708_s8 = sld [smem:[#allocation7 + $0x8f]] }
  0xd5   : > { %869 = vrot.lane.b32.xlu0 %v867_v53, %s2107_s11  ;;  %v530_v25 = vsel %vm459_vm1, %v528_v56, %v529_v14  ;;  %v987_v56 = vstv %s2603_s17  ;;  %v998_v60 = vmul.f32 %v2252_v5, %v997_v0  ;;  %s2711_s17 = sld [smem:[#allocation7 + $0xf]] }
  0xd6   : > { %v457_v62 = vpop.permute.xlu1 %456  ;;  %v988_v32 = vmul.f32 %v2252_v5, %v987_v56  ;;  %s2767_s28 = sld [smem:[#allocation7 + $0x21]] }
  0xd7   : > { %v458_v63 = vrot.slane %v457_v62, 1  ;;  %v447_v2 = vpop.permute.xlu0 %446 }
  0xd8   : > { %v448_v35 = vrot.slane %v447_v2, 1  ;;  %889 = vrot.lane.b32.xlu2 %v887_v59, %s2107_s11 }
  0xd9   : > { %v460_v4 = vsel %vm459_vm1, %v457_v62, %v458_v63 }
  0xda   : > { %v462_v9 = vadd.f32 %v460_v4, %v421_v57  ;;  %v449_v10 = vsel %vm295_vm0, %v447_v2, %v448_v35  ;;  %v558_v11 = vpop.permute.xlu2 %557 }
  0xdb   : > { %v451_v12 = vadd.f32 %v449_v10, %v2511_v18  ;;  %v559_v36 = vrot.slane %v558_v11, 1 }
  0xdc   : > { %v2573_v1 = vadd.f32 %v500_v6, %v462_v9  ;;  %909 = vrot.lane.b32.xlu1 %v907_v3, %s2107_s11  ;;  %v1027_v9 = vstv %s2621_s23  ;;  %s2729_s23 = sld [smem:[#allocation7 + $0x18]] }
  0xdd   : > { %899 = vrot.lane.b32.xlu0 %v897_v7, %s2107_s11  ;;  %v560_v46 = vsel %vm459_vm1, %v558_v11, %v559_v36  ;;  %v1017_v11 = vstv %s2624_s18  ;;  %v1028_v14 = vmul.f32 %v2267_v19, %v1027_v9  ;;  %s2732_s18 = sld [smem:[#allocation7 + $0x18f]] }
  0xde   : > { %v488_v16 = vpop.permute.xlu1 %487 }
  0xdf   : > { %v489_v21 = vrot.slane %v488_v16, 1  ;;  %v478_v22 = vpop.permute.xlu0 %477 }
  0xe0   : > { %v479_v18 = vrot.slane %v478_v22, 1  ;;  %919 = vrot.lane.b32.xlu2 %v917_v13, %s2107_s11 }
  0xe1   : > { %v490_v24 = vsel %vm459_vm1, %v488_v16, %v489_v21  ;;  %v1018_v16 = vmul.f32 %v2267_v19, %v1017_v11 }
  0xe2   : > { %v492_v29 = vadd.f32 %v490_v24, %v451_v12  ;;  %v480_v30 = vsel %vm459_vm1, %v478_v22, %v479_v18  ;;  %v588_v20 = vpop.permute.xlu2 %587 }
  0xe3   : > { %v482_v31 = vadd.f32 %v480_v30, %v2531_v41  ;;  %v589_v40 = vrot.slane %v588_v20, 1  ;;  %v1047_v30 = vstv %s2645_s24  ;;  %s2756_s24 = sld [smem:[#allocation7 + $0x118]] }
  0xe4   : > { %v2594_v33 = vadd.f32 %v530_v25, %v492_v29  ;;  %939 = vrot.lane.b32.xlu1 %v937_v23, %s2108_s30  ;;  %v1038_v25 = vmul.f32 %v2267_v19, %v1037_v17 }
  0xe5   : > { %929 = vrot.lane.b32.xlu0 %v927_v26, %s2107_s11  ;;  %s2611_s11 = sld [smem:[#allocation7 + $0x18e]]  ;;  %v590_v62 = vsel %vm459_vm1, %v588_v20, %v589_v40 }
  0xe6   : > { %v518_v38 = vpop.permute.xlu1 %517 }
  0xe7   : > { %v519_v42 = vrot.slane %v518_v38, 1  ;;  %v508_v41 = vpop.permute.xlu0 %507 }
  0xe8   : > { %v509_v43 = vrot.slane %v508_v41, 1  ;;  %950 = vrot.lane.b32.xlu2 %v948_v34, %s2108_s30  ;;  %v1058_v34 = vmul.f32 %v2279_v27, %v1057_v28 }
  0xe9   : > { %v520_v45 = vsel %vm459_vm1, %v518_v38, %v519_v42  ;;  %v1048_v38 = vmul.f32 %v2267_v19, %v1047_v30  ;;  %v1087_v19 = vstv %s2663_s10  ;;  %s2777_s10 = sld [smem:[#allocation7 + $0x121]] }
  0xea   : > { %v522_v49 = vadd.f32 %v520_v45, %v482_v31  ;;  %v510_v50 = vsel %vm459_vm1, %v508_v41, %v509_v43  ;;  %v618_v51 = vpop.permute.xlu2 %617 }
  0xeb   : > { %v512_v52 = vadd.f32 %v510_v50, %v2552_v58  ;;  %v1007_v63 = vstv %s2611_s11  ;;  %v619_v8 = vrot.slane %v618_v51, 1  ;;  %s2109_s11 = smov 96  }
  0xec   : > { %v2615_v53 = vadd.f32 %v560_v46, %v522_v49  ;;  %970 = vrot.lane.b32.xlu1 %v968_v44, %s2108_s30  ;;  %v1008_v7 = vmul.f32 %v2252_v5, %v1007_v63  ;;  %v1068_v46 = vmul.f32 %v2279_v27, %v1067_v39  ;;  %v1077_v49 = vstv %s2666_s21  ;;  %s2780_s21 = sld [smem:[#allocation7 + $0xa1]] }
  0xed   : > { %960 = vrot.lane.b32.xlu0 %v958_v47, %s2108_s30  ;;  %v621_v15 = vsel %vm620_vm2, %v618_v51, %v619_v8  ;;  %v1078_v0 = vmul.f32 %v2279_v27, %v1077_v49  ;;  %v1178_v39 = vstv %s2729_s23  ;;  %s2846_s23 = sld [smem:[#allocation7 + $0x110]] }
  0xee   : > { %v548_v55 = vpop.permute.xlu1 %547 }
  0xef   : > { %v549_v57 = vrot.slane %v548_v55, 1  ;;  %v538_v59 = vpop.permute.xlu0 %537 }
  0xf0   : > { %v539_v58 = vrot.slane %v538_v59, 1  ;;  %980 = vrot.lane.b32.xlu2 %v978_v54, %s2108_s30 }
  0xf1   : > { %v550_v61 = vsel %vm459_vm1, %v548_v55, %v549_v57  ;;  %v1097_v55 = vstv %s2674_s22  ;;  %s2788_s22 = sld [smem:[#allocation7 + $0x1a1]] }
  0xf2   : > { %v552_v2 = vadd.f32 %v550_v61, %v512_v52  ;;  %v540_v35 = vsel %vm459_vm1, %v538_v59, %v539_v58  ;;  %v649_v3 = vpop.permute.xlu2 %648  ;;  %v2703_v61 = vld [vmem:[%s2232_s20] ss:$4 sm:$0x7] }
  0xf3   : > { %v542_v4 = vadd.f32 %v540_v35, %v2573_v1  ;;  %v650_v26 = vrot.slane %v649_v3, 1 }
  0xf4   : > { %v2636_v6 = vadd.f32 %v590_v62, %v552_v2  ;;  %1000 = vrot.lane.b32.xlu1 %v998_v60, %s2108_s30  ;;  %v1098_v62 = vmul.f32 %v2703_v61, %v1097_v55  ;;  %v1108_v2 = vstv %s2687_s25  ;;  %s2804_s25 = sld [smem:[#allocation7 + $0x7]] }
  0xf5   : > { %990 = vrot.lane.b32.xlu0 %v988_v32, %s2108_s30  ;;  %v651_v37 = vsel %vm620_vm2, %v649_v3, %v650_v26  ;;  %v1118_v32 = vstv %s2684_s29  ;;  %v1109_v9 = vmul.f32 %v2703_v61, %v1108_v2  ;;  %s2801_s29 = sld [smem:[#allocation7 + $0x87]] }
  0xf6   : > { %v578_v10 = vpop.permute.xlu1 %577 }
  0xf7   : > { %v579_v12 = vrot.slane %v578_v10, 1  ;;  %v568_v1 = vpop.permute.xlu0 %567 }
  0xf8   : > { %v569_v13 = vrot.slane %v568_v1, 1  ;;  %1010 = vrot.lane.b32.xlu2 %v1008_v7, %s2108_s30 }
  0xf9   : > { %v580_v5 = vsel %vm459_vm1, %v578_v10, %v579_v12  ;;  %v1128_v10 = vstv %s2695_s4  ;;  %s2822_s4 = sld [smem:[#allocation7 + $0x10]] }
  0xfa   : > { %v582_v21 = vadd.f32 %v580_v5, %v542_v4  ;;  %v570_v22 = vsel %vm459_vm1, %v568_v1, %v569_v13  ;;  %v679_v18 = vpop.permute.xlu2 %678  ;;  %v1129_v5 = vmul.f32 %v2703_v61, %v1128_v10 }
  0xfb   : > { %v572_v23 = vadd.f32 %v570_v22, %v2594_v33  ;;  %v680_v47 = vrot.slane %v679_v18, 1 }
  0xfc   : > { %v2657_v24 = vadd.f32 %v621_v15, %v582_v21  ;;  %1030 = vrot.lane.b32.xlu1 %v1028_v14, %s2108_s30  ;;  %v1138_v21 = vstv %s2711_s17  ;;  %s2833_s17 = sld [smem:[#allocation7 + $0x90]] }
  0xfd   : > { %1020 = vrot.lane.b32.xlu0 %v1018_v16, %s2108_s30  ;;  %v681_v40 = vsel %vm620_vm2, %v679_v18, %v680_v47  ;;  %v1148_v16 = vstv %s2708_s8  ;;  %s2825_s8 = sld [smem:[#allocation7 + $0x187]] }
  0xfe   : > { %v608_v29 = vpop.permute.xlu1 %607 }
  0xff   : > { %v609_v20 = vrot.slane %v608_v29, 1  ;;  %v598_v31 = vpop.permute.xlu0 %597 }
 0x100   : > { %v599_v33 = vrot.slane %v598_v31, 1  ;;  %1040 = vrot.lane.b32.xlu2 %v1038_v25, %s2108_s30 }
 0x101   : > { %v610_v36 = vsel %vm459_vm1, %v608_v29, %v609_v20 }
 0x102   : > { %v612_v42 = vadd.f32 %v610_v36, %v572_v23  ;;  %v600_v41 = vsel %vm459_vm1, %v598_v31, %v599_v33  ;;  %v709_v43 = vpop.permute.xlu2 %708 }
 0x103   : > { %v602_v44 = vadd.f32 %v600_v41, %v2615_v53  ;;  %v1088_v53 = vmul.f32 %v2279_v27, %v1087_v19  ;;  %v710_v27 = vrot.slane %v709_v43, 1  ;;  %v1168_v41 = vstv %s2732_s18  ;;  %s2854_s18 = sld [smem:[#allocation7 + $0x19]] }
 0x104   : > { %v2678_v45 = vadd.f32 %v651_v37, %v612_v42  ;;  %1060 = vrot.lane.b32.xlu1 %v1058_v34, %s2108_s30 }
 0x105   : > { %1050 = vrot.lane.b32.xlu0 %v1048_v38, %s2108_s30  ;;  %v711_v8 = vsel %vm620_vm2, %v709_v43, %v710_v27 }
 0x106   : > { %v639_v48 = vpop.permute.xlu1 %638 }
 0x107   : > { %v640_v50 = vrot.slane %v639_v48, 1  ;;  %v629_v51 = vpop.permute.xlu0 %628 }
 0x108   : > { %v630_v52 = vrot.slane %v629_v51, 1  ;;  %1070 = vrot.lane.b32.xlu2 %v1068_v46, %s2108_s30  ;;  %v2759_v46 = vld [vmem:[%s2232_s20 + $0x2] ss:$4 sm:$0x7] }
 0x109   : > { %v641_v54 = vsel %vm620_vm2, %v639_v48, %v640_v50  ;;  %v1179_v47 = vmul.f32 %v2759_v46, %v1178_v39  ;;  %v1188_v50 = vstv %s2743_s26  ;;  %s2864_s26 = sld [smem:[#allocation7 + $0x119]] }
 0x10a   : > { %v643_v56 = vadd.f32 %v641_v54, %v602_v44  ;;  %v631_v57 = vsel %vm620_vm2, %v629_v51, %v630_v52  ;;  %v739_v59 = vpop.permute.xlu2 %738 }
 0x10b   : > { %v633_v58 = vadd.f32 %v631_v57, %v2636_v6  ;;  %v1119_v6 = vmul.f32 %v2703_v61, %v1118_v32  ;;  %v740_v15 = vrot.slane %v739_v59, 1 }
 0x10c   : > { %v2699_v60 = vadd.f32 %v681_v40, %v643_v56  ;;  %1090 = vrot.lane.b32.xlu1 %v1088_v53, %s2108_s30  ;;  %v1208_v56 = vstv %s2753_s9  ;;  %s2867_s9 = sld [smem:[#allocation7 + $0x99]] }
 0x10d   : > { %1080 = vrot.lane.b32.xlu0 %v1078_v0, %s2108_s30  ;;  %s2719_s30 = sld [smem:[#allocation7 + $0x10f]]  ;;  %v741_v28 = vsel %vm620_vm2, %v739_v59, %v740_v15  ;;  %v1189_v0 = vmul.f32 %v2759_v46, %v1188_v50  ;;  %v1198_v59 = vstv %s2756_s24  ;;  %v1209_v27 = vmul.f32 %v2759_v46, %v1208_v56 }
 0x10e   : > { %v669_v63 = vpop.permute.xlu1 %668  ;;  %v1199_v2 = vmul.f32 %v2759_v46, %v1198_v59  ;;  %s2875_s24 = sld [smem:[#allocation7 + $0x199]] }
 0x10f   : > { %v670_v35 = vrot.slane %v669_v63, 1  ;;  %v659_v3 = vpop.permute.xlu0 %658 }
 0x110   : > { %v660_v4 = vrot.slane %v659_v3, 1  ;;  %1100 = vrot.lane.b32.xlu2 %v1098_v62, %s2109_s11 }
 0x111   : > { %v671_v7 = vsel %vm620_vm2, %v669_v63, %v670_v35  ;;  %v1218_v35 = vstv %s2767_s28  ;;  %s2885_s28 = sld [smem:[#allocation7 + $0xa2]] }
 0x112   : > { %v673_v11 = vadd.f32 %v671_v7, %v633_v58  ;;  %v661_v12 = vsel %vm620_vm2, %v659_v3, %v660_v4  ;;  %v769_v1 = vpop.permute.xlu2 %768 }
 0x113   : > { %v663_v13 = vadd.f32 %v661_v12, %v2657_v24  ;;  %v2735_v24 = vld [vmem:[%s2232_s20 + $0x1] ss:$4 sm:$0x7]  ;;  %v1158_v30 = vstv %s2719_s30  ;;  %v770_v38 = vrot.slane %v769_v1, 1  ;;  %v1238_v12 = vstv %s2777_s10  ;;  %s2843_s30 = sld [smem:[#allocation7 + $0x190]] }
 0x114   : > { %v2723_v14 = vadd.f32 %v711_v8, %v673_v11  ;;  %1121 = vrot.lane.b32.xlu1 %v1119_v6, %s2109_s11  ;;  %v1149_v25 = vmul.f32 %v2735_v24, %v1148_v16  ;;  %v1139_v29 = vmul.f32 %v2735_v24, %v1138_v21  ;;  %v1159_v37 = vmul.f32 %v2735_v24, %v1158_v30  ;;  %s2888_s10 = sld [smem:[#allocation7 + $0x22]] }
 0x115   : > { %1111 = vrot.lane.b32.xlu0 %v1109_v9, %s2109_s11  ;;  %v771_v48 = vsel %vm620_vm2, %v769_v1, %v770_v38  ;;  %v1169_v49 = vmul.f32 %v2735_v24, %v1168_v41  ;;  %v2796_v9 = vld [vmem:[%s2232_s20 + $0x3] ss:$4 sm:$0x7]  ;;  %s2812_s20 = sld [smem:[#allocation7 + $0x107]] }
 0x116   : > { %v699_v17 = vpop.permute.xlu1 %698  ;;  %v1219_v10 = vmul.f32 %v2796_v9, %v1218_v35  ;;  %v1239_v16 = vmul.f32 %v2796_v9, %v1238_v12 }
 0x117   : > { %v700_v22 = vrot.slane %v699_v17, 1  ;;  %v689_v18 = vpop.permute.xlu0 %688 }
 0x118   : > { %v690_v23 = vrot.slane %v689_v18, 1  ;;  %1131 = vrot.lane.b32.xlu2 %v1129_v5, %s2109_s11 }
 0x119   : > { %v701_v26 = vsel %vm620_vm2, %v699_v17, %v700_v22 }
 0x11a   : > { %v703_v20 = vadd.f32 %v701_v26, %v663_v13  ;;  %v691_v31 = vsel %vm620_vm2, %v689_v18, %v690_v23  ;;  %v800_v33 = vpop.permute.xlu2 %799  ;;  %v1228_v13 = vstv %s2780_s21  ;;  %v1248_v18 = vstv %s2788_s22  ;;  %s2896_s21 = sld [smem:[#allocation7 + $0x122]] }
 0x11b   : > { %v693_v34 = vadd.f32 %v691_v31, %v2678_v45  ;;  %v801_v55 = vrot.slane %v800_v33, 1  ;;  %v1229_v22 = vmul.f32 %v2796_v9, %v1228_v13  ;;  %v1249_v30 = vmul.f32 %v2796_v9, %v1248_v18  ;;  %s2906_s22 = sld [smem:[#allocation7 + $0x8]] }
 0x11c   : > { %v2747_v36 = vadd.f32 %v741_v28, %v703_v20  ;;  %1151 = vrot.lane.b32.xlu1 %v1149_v25, %s2109_s11  ;;  %v1269_v31 = vstv %s2801_s29  ;;  %s2909_s29 = sld [smem:[#allocation7 + $0x1a2]] }
 0x11d   : > { %1141 = vrot.lane.b32.xlu0 %v1139_v29, %s2109_s11  ;;  %v802_v63 = vsel %vm781_vm3, %v800_v33, %v801_v55  ;;  %v1270_v39 = vmul.f32 %v2703_v61, %v1269_v31 }
 0x11e   : > { %v729_v42 = vpop.permute.xlu1 %728 }
 0x11f   : > { %v730_v43 = vrot.slane %v729_v42, 1  ;;  %v719_v44 = vpop.permute.xlu0 %718 }
 0x120   : > { %v720_v45 = vrot.slane %v719_v44, 1  ;;  %1161 = vrot.lane.b32.xlu2 %v1159_v37, %s2109_s11 }
 0x121   : > { %v731_v19 = vsel %vm620_vm2, %v729_v42, %v730_v43 }
 0x122   : > { %v733_v51 = vadd.f32 %v731_v19, %v693_v34  ;;  %v721_v52 = vsel %vm620_vm2, %v719_v44, %v720_v45  ;;  %v830_v53 = vpop.permute.xlu2 %829  ;;  %v1258_v34 = vstv %s2804_s25  ;;  %v1279_v44 = vstv %s2812_s20  ;;  %s2917_s25 = sld [smem:[#allocation7 + $0x88]] }
 0x123   : > { %v723_v54 = vadd.f32 %v721_v52, %v2699_v60  ;;  %v831_v11 = vrot.slane %v830_v53, 1  ;;  %v1259_v43 = vmul.f32 %v2703_v61, %v1258_v34  ;;  %v1280_v50 = vmul.f32 %v2703_v61, %v1279_v44  ;;  %s2927_s20 = sld [smem:[#allocation7 + $0x188]] }
 0x124   : > { %v2771_v40 = vadd.f32 %v771_v48, %v733_v51  ;;  %1181 = vrot.lane.b32.xlu1 %v1179_v47, %s2109_s11  ;;  %v1299_v52 = vstv %s2822_s4  ;;  %s2930_s4 = sld [smem:[#allocation7 + $0x108]] }
 0x125   : > { %1171 = vrot.lane.b32.xlu0 %v1169_v49, %s2109_s11  ;;  %v832_v21 = vsel %vm781_vm3, %v830_v53, %v831_v11  ;;  %v1300_v56 = vmul.f32 %v2735_v24, %v1299_v52 }
 0x126   : > { %v759_v57 = vpop.permute.xlu1 %758 }
 0x127   : > { %v760_v58 = vrot.slane %v759_v57, 1  ;;  %v749_v60 = vpop.permute.xlu0 %748 }
 0x128   : > { %v750_v62 = vrot.slane %v749_v60, 1  ;;  %1191 = vrot.lane.b32.xlu2 %v1189_v0, %s2109_s11 }
 0x129   : > { %v761_v32 = vsel %vm620_vm2, %v759_v57, %v760_v58 }
 0x12a   : > { %v763_v3 = vadd.f32 %v761_v32, %v723_v54  ;;  %v751_v4 = vsel %vm620_vm2, %v749_v60, %v750_v62  ;;  %v860_v6 = vpop.permute.xlu2 %859  ;;  %v1289_v54 = vstv %s2825_s8  ;;  %v1309_v60 = vstv %s2833_s17  ;;  %s2938_s8 = sld [smem:[#allocation7 + $0x11]]  ;;  %s2111_s17 = smov 94  }
 0x12b   : > { %v753_v7 = vadd.f32 %v751_v4, %v2723_v14  ;;  %v861_v20 = vrot.slane %v860_v6, 1  ;;  %v1290_v58 = vmul.f32 %v2703_v61, %v1289_v54  ;;  %v1310_v35 = vmul.f32 %v2735_v24, %v1309_v60 }
 0x12c   : > { %v2792_v8 = vadd.f32 %v802_v63, %v763_v3  ;;  %1211 = vrot.lane.b32.xlu1 %v1209_v27, %s2109_s11  ;;  %v1329_v4 = vstv %s2843_s30  ;;  %s2948_s30 = sld [smem:[#allocation7 + $0x111]] }
 0x12d   : > { %1201 = vrot.lane.b32.xlu0 %v1199_v2, %s2109_s11  ;;  %v862_v41 = vsel %vm781_vm3, %v860_v6, %v861_v20  ;;  %v1330_v12 = vmul.f32 %v2735_v24, %v1329_v4 }
 0x12e   : > { %v790_v1 = vpop.permute.xlu1 %789 }
 0x12f   : > { %v791_v14 = vrot.slane %v790_v1, 1  ;;  %v779_v5 = vpop.permute.xlu0 %778 }
 0x130   : > { %v780_v15 = vrot.slane %v779_v5, 1  ;;  %1221 = vrot.lane.b32.xlu2 %v1219_v10, %s2109_s11 }
 0x131   : > { %v792_v17 = vsel %vm781_vm3, %v790_v1, %v791_v14 }
 0x132   : > { %v794_v23 = vadd.f32 %v792_v17, %v753_v7  ;;  %v782_v25 = vsel %vm781_vm3, %v779_v5, %v780_v15  ;;  %v890_v26 = vpop.permute.xlu2 %889  ;;  %v1319_v7 = vstv %s2846_s23  ;;  %v1339_v5 = vstv %s2854_s18  ;;  %s2951_s23 = sld [smem:[#allocation7 + $0x91]] }
 0x133   : > { %v784_v28 = vadd.f32 %v782_v25, %v2747_v36  ;;  %v891_v51 = vrot.slane %v890_v26, 1  ;;  %v1320_v14 = vmul.f32 %v2735_v24, %v1319_v7  ;;  %v1340_v18 = vmul.f32 %v2759_v46, %v1339_v5  ;;  %s2969_s18 = sld [smem:[#allocation7 + $0x9a]] }
 0x134   : > { %v2816_v29 = vadd.f32 %v832_v21, %v794_v23  ;;  %1241 = vrot.lane.b32.xlu1 %v1239_v16, %s2109_s11  ;;  %v1359_v25 = vstv %s2864_s26  ;;  %s2972_s26 = sld [smem:[#allocation7 + $0x1a]] }
 0x135   : > { %1231 = vrot.lane.b32.xlu0 %v1229_v22, %s2109_s11  ;;  %v892_v59 = vsel %vm781_vm3, %v890_v26, %v891_v51  ;;  %v1360_v31 = vmul.f32 %v2759_v46, %v1359_v25 }
 0x136   : > { %v820_v33 = vpop.permute.xlu1 %819 }
 0x137   : > { %v821_v37 = vrot.slane %v820_v33, 1  ;;  %v810_v38 = vpop.permute.xlu0 %809 }
 0x138   : > { %v811_v36 = vrot.slane %v810_v38, 1  ;;  %1251 = vrot.lane.b32.xlu2 %v1249_v30, %s2109_s11  ;;  %s2110_s11 = smov 95  }
 0x139   : > { %v822_v42 = vsel %vm781_vm3, %v820_v33, %v821_v37 }
 0x13a   : > { %v824_v45 = vadd.f32 %v822_v42, %v784_v28  ;;  %v812_v47 = vsel %vm781_vm3, %v810_v38, %v811_v36  ;;  %v920_v19 = vpop.permute.xlu2 %919  ;;  %v1349_v28 = vstv %s2867_s9  ;;  %v1369_v38 = vstv %s2875_s24  ;;  %s2980_s9 = sld [smem:[#allocation7 + $0x11a]] }
 0x13b   : > { %v814_v48 = vadd.f32 %v812_v47, %v2771_v40  ;;  %v921_v3 = vrot.slane %v920_v19, 1  ;;  %v1350_v37 = vmul.f32 %v2759_v46, %v1349_v28  ;;  %v1370_v44 = vmul.f32 %v2759_v46, %v1369_v38  ;;  %s2990_s24 = sld [smem:[#allocation7 + $0x23]] }
 0x13c   : > { %v2837_v49 = vadd.f32 %v862_v41, %v824_v45  ;;  %1272 = vrot.lane.b32.xlu1 %v1270_v39, %s2110_s11  ;;  %v1389_v47 = vstv %s2885_s28  ;;  %s2993_s28 = sld [smem:[#allocation7 + $0x19a]] }
 0x13d   : > { %1261 = vrot.lane.b32.xlu0 %v1259_v43, %s2110_s11  ;;  %v922_v13 = vsel %vm781_vm3, %v920_v19, %v921_v3  ;;  %v1390_v52 = vmul.f32 %v2796_v9, %v1389_v47 }
 0x13e   : > { %v850_v53 = vpop.permute.xlu1 %849 }
 0x13f   : > { %v851_v0 = vrot.slane %v850_v53, 1  ;;  %v840_v40 = vpop.permute.xlu0 %839 }
 0x140   : > { %v841_v55 = vrot.slane %v840_v40, 1  ;;  %1282 = vrot.lane.b32.xlu2 %v1280_v50, %s2110_s11 }
 0x141   : > { %v852_v57 = vsel %vm781_vm3, %v850_v53, %v851_v0 }
 0x142   : > { %v854_v62 = vadd.f32 %v852_v57, %v814_v48  ;;  %v842_v27 = vsel %vm781_vm3, %v840_v40, %v841_v55  ;;  %v951_v32 = vpop.permute.xlu2 %950  ;;  %v1379_v48 = vstv %s2888_s10  ;;  %v1399_v40 = vstv %s2896_s21  ;;  %s3001_s10 = sld [smem:[#allocation7 + $0xa3]] }
 0x143   : > { %v844_v63 = vadd.f32 %v842_v27, %v2792_v8  ;;  %v952_v23 = vrot.slane %v951_v32, 1  ;;  %v1380_v0 = vmul.f32 %v2796_v9, %v1379_v48  ;;  %v1400_v60 = vmul.f32 %v2796_v9, %v1399_v40  ;;  %s1871_s21 = sld [smem:[#allocation7 + $0x1a3]] }
 0x144   : > { %v2858_v2 = vadd.f32 %v892_v59, %v854_v62  ;;  %1302 = vrot.lane.b32.xlu1 %v1300_v56, %s2110_s11  ;;  %v1419_v27 = vstv %s2906_s22  ;;  %s1870_s22 = sld [smem:[#allocation7 + $0x123]] }
 0x145   : > { %1292 = vrot.lane.b32.xlu0 %v1290_v58, %s2110_s11  ;;  %v953_v34 = vsel %vm942_vm4, %v951_v32, %v952_v23  ;;  %v1420_v4 = vmul.f32 %v2703_v61, %v1419_v27 }
 0x146   : > { %v880_v6 = vpop.permute.xlu1 %879 }
 0x147   : > { %v881_v10 = vrot.slane %v880_v6, 1  ;;  %v870_v11 = vpop.permute.xlu0 %869 }
 0x148   : > { %v871_v8 = vrot.slane %v870_v11, 1  ;;  %1312 = vrot.lane.b32.xlu2 %v1310_v35, %s2110_s11 }
 0x149   : > { %v882_v1 = vsel %vm781_vm3, %v880_v6, %v881_v10 }
 0x14a   : > { %v884_v15 = vadd.f32 %v882_v1, %v844_v63  ;;  %v872_v16 = vsel %vm781_vm3, %v870_v11, %v871_v8  ;;  %v981_v17 = vpop.permute.xlu2 %980  ;;  %v1409_v63 = vstv %s2909_s29  ;;  %v1430_v11 = vstv %s2917_s25  ;;  %s3081_s29 = sld [smem:[#allocation8 + $0x1]] }
 0x14b   : > { %v874_v21 = vadd.f32 %v872_v16, %v2816_v29  ;;  %v982_v45 = vrot.slane %v981_v17, 1  ;;  %v1410_v10 = vmul.f32 %v2796_v9, %v1409_v63  ;;  %v1431_v5 = vmul.f32 %v2703_v61, %v1430_v11  ;;  %s3099_s25 = sld [smem:[#allocation8]] }
 0x14c   : > { %v2879_v22 = vadd.f32 %v922_v13, %v884_v15  ;;  %1332 = vrot.lane.b32.xlu1 %v1330_v12, %s2110_s11  ;;  %v1450_v16 = vstv %s2927_s20  ;;  %v1520_v63 = vstv %s2980_s9  ;;  %v1540_v11 = vstv %s2990_s24  ;;  %s1722_s20 = sshll.u32 %s2228_s7, 3  ;;  %s1603_s9 = scalar_lea.sflag [#allocation4], %s2228_s7 }
 0x14d   : > { %1322 = vrot.lane.b32.xlu0 %v1320_v14, %s2110_s11  ;;  %v983_v54 = vsel %vm942_vm4, %v981_v17, %v982_v45  ;;  %v1451_v25 = vmul.f32 %v2703_v61, %v1450_v16 }
 0x14e   : > { %v910_v26 = vpop.permute.xlu1 %909 }
 0x14f   : > { %v911_v30 = vrot.slane %v910_v26, 1  ;;  %v900_v29 = vpop.permute.xlu0 %899 }
 0x150   : > { %v901_v20 = vrot.slane %v900_v29, 1  ;;  %1342 = vrot.lane.b32.xlu2 %v1340_v18, %s2110_s11 }
 0x151   : > { %v912_v33 = vsel %vm781_vm3, %v910_v26, %v911_v30 }
 0x152   : > { %v914_v36 = vadd.f32 %v912_v33, %v874_v21  ;;  %v902_v39 = vsel %vm781_vm3, %v900_v29, %v901_v20  ;;  %v1011_v42 = vpop.permute.xlu2 %1010  ;;  %v1440_v21 = vstv %s2930_s4  ;;  %v1460_v29 = vstv %s2938_s8  ;;  %s3125_s4 = scalar_lea.vmem [#allocation9], %s1722_s20  ;;  %s1876_s8 = sld [smem:[#allocation8 + $0x3]] }
 0x153   : > { %v904_v41 = vadd.f32 %v902_v39, %v2837_v49  ;;  %v1012_v62 = vrot.slane %v1011_v42, 1  ;;  %v1441_v30 = vmul.f32 %v2703_v61, %v1440_v21  ;;  %v1461_v38 = vmul.f32 %v2735_v24, %v1460_v29 }
 0x154   : > { %v2900_v43 = vadd.f32 %v953_v34, %v914_v36  ;;  %1362 = vrot.lane.b32.xlu1 %v1360_v31, %s2110_s11  ;;  %v1480_v61 = vstv %s2948_s30  ;;  %v1550_v21 = vstv %s3001_s10  ;;  %v1570_v29 = vstv %s1871_s21  ;;  %s1883_s30 = sshll.u32 %s2153_s16, 3  ;;  %s1616_s16 = sshll.u32 %s3125_s4, 4  ;;  %s1617_s16 = int_to_ptr.vmem [resolvable:$true] %s1616_s16 }
 0x155   : > { %1352 = vrot.lane.b32.xlu0 %v1350_v37, %s2110_s11  ;;  %v1013_v7 = vsel %vm942_vm4, %v1011_v42, %v1012_v62  ;;  %v1470_v42 = vstv %s2951_s23  ;;  %v1481_v45 = vmul.f32 %v2735_v24, %v1480_v61 }
 0x156   : > { %v940_v19 = vpop.permute.xlu1 %939  ;;  %v1471_v48 = vmul.f32 %v2735_v24, %v1470_v42 }
 0x157   : > { %v941_v50 = vrot.slane %v940_v19, 1  ;;  %v930_v51 = vpop.permute.xlu0 %929 }
 0x158   : > { %v931_v49 = vrot.slane %v930_v51, 1  ;;  %1372 = vrot.lane.b32.xlu2 %v1370_v44, %s2110_s11 }
 0x159   : > { %v943_v53 = vsel %vm942_vm4, %v940_v19, %v941_v50 }
 0x15a   : > { %v945_v55 = vadd.f32 %v943_v53, %v904_v41  ;;  %v932_v56 = vsel %vm781_vm3, %v930_v51, %v931_v49  ;;  %v1041_v57 = vpop.permute.xlu2 %1040 }
 0x15b   : > { %v934_v59 = vadd.f32 %v932_v56, %v2858_v2  ;;  %v1042_v15 = vrot.slane %v1041_v57, 1 }
 0x15c   : > { %v2921_v58 = vadd.f32 %v983_v54, %v945_v55  ;;  %1392 = vrot.lane.b32.xlu1 %v1390_v52, %s2110_s11  ;;  %v1510_v55 = vstv %s2969_s18  ;;  %s1614_s18 = scalar_lea.hbm %s3188_s3, %s1883_s30 }
 0x15d   : > { %1382 = vrot.lane.b32.xlu0 %v1380_v0, %s2110_s11  ;;  %v1043_v28 = vsel %vm942_vm4, %v1041_v57, %v1042_v15  ;;  %v1500_v57 = vstv %s2972_s26  ;;  %v1511_v62 = vmul.f32 %v2759_v46, %v1510_v55  ;;  %v1541_v15 = vmul.f32 %v2796_v9, %v1540_v11  ;;  %s1618_s26 = sshll.u32 %s1614_s18, 4  ;;  %s1619_s26 = int_to_ptr.hbm [resolvable:$true] %s1618_s26 }
 0x15e   : > { %v971_v32 = vpop.permute.xlu1 %970  ;;  %s2040_s24 = sshra.s32 %s1619_s26, 4  ;;  %s2041_s24 = int_to_ptr.hbm [resolvable:$true] %s2040_s24 }
 0x15f   : > { %v972_v35 = vrot.slane %v971_v32, 1  ;;  %v961_v3 = vpop.permute.xlu0 %960  ;;  %p2047_p9 = scmp.lt.s32.totalorder %s2041_s24, %s3188_s3 }
 0x160   : > { %v962_v2 = vrot.slane %v961_v3, 1  ;;  %1402 = vrot.lane.b32.xlu2 %v1400_v60, %s2110_s11 }
 0x161   : > { %v973_v6 = vsel %vm942_vm4, %v971_v32, %v972_v35  ;;  %v1501_v32 = vmul.f32 %v2759_v46, %v1500_v57 }
 0x162   : > { %v975_v8 = vadd.f32 %v973_v6, %v934_v59  ;;  %v963_v12 = vsel %vm942_vm4, %v961_v3, %v962_v2  ;;  %v1071_v1 = vpop.permute.xlu2 %1070 }
 0x163   : > { %v965_v13 = vadd.f32 %v963_v12, %v2879_v22  ;;  %v1072_v36 = vrot.slane %v1071_v1, 1  ;;  %v1530_v12 = vstv %s2993_s28  ;;  %s2042_s28 = scalar_lea.hbm %s2041_s24, 8 }
 0x164   : > { %v2942_v14 = vadd.f32 %v1013_v7, %v975_v8  ;;  %1422 = vrot.lane.b32.xlu1 %v1420_v4, %s2111_s17  ;;  %v1521_v7 = vmul.f32 %v2759_v46, %v1520_v63  ;;  %p2043_p1 = scmp.ne.s32.totalorder %s2041_s24, %s2042_s28 }
 0x165   : > { %1412 = vrot.lane.b32.xlu0 %v1410_v10, %s2110_s11  ;;  %s2959_s11 = sld [smem:[#allocation7 + $0x191]]  ;;  %v1073_v19 = vsel %vm942_vm4, %v1071_v1, %v1072_v36 }
 0x166   : > { %v1001_v17 = vpop.permute.xlu1 %1000  ;;  %p2044_p4 = pnand %p2043_p1, %p2201_p5 }
 0x167   : > { %v1002_v18 = vrot.slane %v1001_v17, 1  ;;  %v991_v22 = vpop.permute.xlu0 %990 }
 0x168   : > { %v992_v23 = vrot.slane %v991_v22, 1  ;;  %1433 = vrot.lane.b32.xlu2 %v1431_v5, %s2111_s17  ;;  %p2045_p8 = pneg %p2044_p4 }
 0x169   : > { %v1003_v26 = vsel %vm942_vm4, %v1001_v17, %v1002_v18  ;;  %v1531_v17 = vmul.f32 %v2759_v46, %v1530_v12 }
 0x16a   : > { %v1005_v20 = vadd.f32 %v1003_v26, %v965_v13  ;;  %v993_v31 = vsel %vm942_vm4, %v991_v22, %v992_v23  ;;  %v1101_v33 = vpop.permute.xlu2 %1100 }
 0x16b   : > { %v995_v34 = vadd.f32 %v993_v31, %v2900_v43  ;;  %v1490_v50 = vstv %s2959_s11  ;;  %v1102_v40 = vrot.slane %v1101_v33, 1  ;;  %v1560_v31 = vstv %s1870_s22  ;;  %s2046_s22 = scalar_lea.hbm %s3188_s3, 16 }
 0x16c   : > { %v2963_v37 = vadd.f32 %v1043_v28, %v1005_v20  ;;  %1453 = vrot.lane.b32.xlu1 %v1451_v25, %s2111_s17  ;;  %v1491_v0 = vmul.f32 %v2735_v24, %v1490_v50  ;;  %v1551_v28 = vmul.f32 %v2796_v9, %v1550_v21  ;;  %v1561_v61 = vmul.f32 %v2796_v9, %v1560_v31  ;;  %p2048_p10 = scmp.lt.s32.totalorder %s2046_s22, %s2042_s28 }
 0x16d   : > { %1443 = vrot.lane.b32.xlu0 %v1441_v30, %s2111_s17  ;;  %v1104_v27 = vsel %vm1103_vm5, %v1101_v33, %v1102_v40 }
 0x16e   : > { %v1031_v39 = vpop.permute.xlu1 %1030  ;;  %p2049_p2 = por %p2048_p10, %p2047_p9 }
 0x16f   : > { %v1032_v41 = vrot.slane %v1031_v39, 1  ;;  %v1021_v44 = vpop.permute.xlu0 %1020 }
 0x170   : > { %v1022_v43 = vrot.slane %v1021_v44, 1  ;;  %1463 = vrot.lane.b32.xlu2 %v1461_v38, %s2111_s17  ;;  %v1571_v38 = vmul.f32 %v2796_v9, %v1570_v29  ;;  %p2050_p11 = pnand %p2049_p2, %p2045_p8 }
 0x171   : > { %v1033_v47 = vsel %vm942_vm4, %v1031_v39, %v1032_v41 }
 0x172   : > { %v1035_v51 = vadd.f32 %v1033_v47, %v995_v34  ;;  %v1023_v49 = vsel %vm942_vm4, %v1021_v44, %v1022_v43  ;;  %v1132_v52 = vpop.permute.xlu2 %1131 }
 0x173   : > { %v1025_v53 = vadd.f32 %v1023_v49, %v2921_v58  ;;  %v1133_v10 = vrot.slane %v1132_v52, 1 }
 0x174   : > { %v2984_v54 = vadd.f32 %v1073_v19, %v1035_v51  ;;  %1483 = vrot.lane.b32.xlu1 %v1481_v45, %s2111_s17 }
 0x175   : > { %1473 = vrot.lane.b32.xlu0 %v1471_v48, %s2111_s17  ;;  %v1134_v16 = vsel %vm1103_vm5, %v1132_v52, %v1133_v10 }
 0x176   : > { %v1061_v56 = vpop.permute.xlu1 %1060 }
 0x177   : > { %v1062_v59 = vrot.slane %v1061_v56, 1  ;;  %v1051_v58 = vpop.permute.xlu0 %1050 }
 0x178   : > { %v1052_v60 = vrot.slane %v1051_v58, 1  ;;  %1493 = vrot.lane.b32.xlu2 %v1491_v0, %s2111_s17 }
 0x179   : > { %v1063_v24 = vsel %vm942_vm4, %v1061_v56, %v1062_v59 }
 0x17a   : > { %v1065_v35 = vadd.f32 %v1063_v24, %v1025_v53  ;;  %v1053_v3 = vsel %vm942_vm4, %v1051_v58, %v1052_v60  ;;  %v1162_v2 = vpop.permute.xlu2 %1161 }
 0x17b   : > { %v1055_v4 = vadd.f32 %v1053_v3, %v2942_v14  ;;  %v1163_v30 = vrot.slane %v1162_v2, 1 }
 0x17c   : > { %v1106_v6 = vadd.f32 %v1104_v27, %v1065_v35  ;;  %1513 = vrot.lane.b32.xlu1 %v1511_v62, %s2111_s17 }
 0x17d   : > { %1503 = vrot.lane.b32.xlu0 %v1501_v32, %s2111_s17  ;;  %v1164_v36 = vsel %vm1103_vm5, %v1162_v2, %v1163_v30 }
 0x17e   : > { %v1091_v8 = vpop.permute.xlu1 %1090 }
 0x17f   : > { %v1092_v1 = vrot.slane %v1091_v8, 1  ;;  %v1081_v13 = vpop.permute.xlu0 %1080 }
 0x180   : > { %v1082_v5 = vrot.slane %v1081_v13, 1  ;;  %1523 = vrot.lane.b32.xlu2 %v1521_v7, %s2111_s17 }
 0x181   : > { %v1093_v14 = vsel %vm942_vm4, %v1091_v8, %v1092_v1 }
 0x182   : > { %v1095_v18 = vadd.f32 %v1093_v14, %v1055_v4  ;;  %v1083_v22 = vsel %vm942_vm4, %v1081_v13, %v1082_v5  ;;  %v1192_v23 = vpop.permute.xlu2 %1191 }
 0x183   : > { %v1085_v25 = vadd.f32 %v1083_v22, %v2963_v37  ;;  %v1193_v45 = vrot.slane %v1192_v23, 1 }
 0x184   : > { %v1136_v26 = vadd.f32 %v1134_v16, %v1095_v18  ;;  %1543 = vrot.lane.b32.xlu1 %v1541_v15, %s2111_s17 }
 0x185   : > { %1533 = vrot.lane.b32.xlu0 %v1531_v17, %s2111_s17  ;;  %v1194_v9 = vsel %vm1103_vm5, %v1192_v23, %v1193_v45 }
 0x186   : > { %v1122_v20 = vpop.permute.xlu1 %1121 }
 0x187   : > { %v1123_v33 = vrot.slane %v1122_v20, 1  ;;  %v1112_v46 = vpop.permute.xlu0 %1111 }
 0x188   : > { %v1113_v34 = vrot.slane %v1112_v46, 1  ;;  %1553 = vrot.lane.b32.xlu2 %v1551_v28, %s2111_s17 }
 0x189   : > { %v1124_v37 = vsel %vm1103_vm5, %v1122_v20, %v1123_v33 }
 0x18a   : > { %v1126_v39 = vadd.f32 %v1124_v37, %v1085_v25  ;;  %v1114_v42 = vsel %vm1103_vm5, %v1112_v46, %v1113_v34  ;;  %v1222_v41 = vpop.permute.xlu2 %1221 }
 0x18b   : > { %v1116_v44 = vadd.f32 %v1114_v42, %v2984_v54  ;;  %v1223_v40 = vrot.slane %v1222_v41, 1 }
 0x18c   : > { %v1166_v43 = vadd.f32 %v1164_v36, %v1126_v39  ;;  %1573 = vrot.lane.b32.xlu1 %v1571_v38, %s2111_s17 }
 0x18d   : > { %1563 = vrot.lane.b32.xlu0 %v1561_v61, %s2111_s17  ;;  %v1224_v60 = vsel %vm1103_vm5, %v1222_v41, %v1223_v40  ;;  %s1874_s17 = sld [smem:[#allocation8 + $0x2]] }
 0x18e   : > { %v1152_v47 = vpop.permute.xlu1 %1151 }
 0x18f   : > { %v1153_v19 = vrot.slane %v1152_v47, 1  ;;  %v1142_v48 = vpop.permute.xlu0 %1141 }
 0x190   : > { %v1143_v50 = vrot.slane %v1142_v48, 1 }
 0x191   : > { %v1154_v51 = vsel %vm1103_vm5, %v1152_v47, %v1153_v19 }
 0x192   : > { %v1156_v49 = vadd.f32 %v1154_v51, %v1116_v44  ;;  %v1144_v52 = vsel %vm1103_vm5, %v1142_v48, %v1143_v50  ;;  %v1252_v53 = vpop.permute.xlu2 %1251 }
 0x193   : > { %v1146_v0 = vadd.f32 %v1144_v52, %v1106_v6  ;;  %v1253_v35 = vrot.slane %v1252_v53, 1 }
 0x194   : > { %v1196_v54 = vadd.f32 %v1194_v9, %v1156_v49 }
 0x195   : > { %v1254_v10 = vsel %vm1103_vm5, %v1252_v53, %v1253_v35 }
 0x196   : > { %v1182_v55 = vpop.permute.xlu1 %1181 }
 0x197   : > { %v1183_v56 = vrot.slane %v1182_v55, 1  ;;  %v1172_v57 = vpop.permute.xlu0 %1171 }
 0x198   : > { %v1173_v59 = vrot.slane %v1172_v57, 1 }
 0x199   : > { %v1184_v58 = vsel %vm1103_vm5, %v1182_v55, %v1183_v56 }
 0x19a   : > { %v1186_v62 = vadd.f32 %v1184_v58, %v1146_v0  ;;  %v1174_v24 = vsel %vm1103_vm5, %v1172_v57, %v1173_v59  ;;  %v1283_v27 = vpop.permute.xlu2 %1282 }
 0x19b   : > { %v1176_v32 = vadd.f32 %v1174_v24, %v1136_v26  ;;  %v1284_v5 = vrot.slane %v1283_v27, 1 }
 0x19c   : > { %v3036_v63 = vadd.f32 %v1224_v60, %v1186_v62 }
 0x19d   : > { %v1285_v21 = vsel %vm1264_vm6, %v1283_v27, %v1284_v5 }
 0x19e   : > { %v1212_v3 = vpop.permute.xlu1 %1211 }
 0x19f   : > { %v1213_v2 = vrot.slane %v1212_v3, 1  ;;  %v1202_v4 = vpop.permute.xlu0 %1201 }
 0x1a0   : > { %v1203_v6 = vrot.slane %v1202_v4, 1 }
 0x1a1   : > { %v1214_v7 = vsel %vm1103_vm5, %v1212_v3, %v1213_v2 }
 0x1a2   : > { %v1216_v11 = vadd.f32 %v1214_v7, %v1176_v32  ;;  %v1204_v8 = vsel %vm1103_vm5, %v1202_v4, %v1203_v6  ;;  %v1313_v12 = vpop.permute.xlu2 %1312 }
 0x1a3   : > { %v1206_v1 = vadd.f32 %v1204_v8, %v1166_v43  ;;  %v1314_v48 = vrot.slane %v1313_v12, 1 }
 0x1a4   : > { %v3041_v13 = vadd.f32 %v1254_v10, %v1216_v11 }
 0x1a5   : > { %v1315_v0 = vsel %vm1264_vm6, %v1313_v12, %v1314_v48 }
 0x1a6   : > { %v1242_v15 = vpop.permute.xlu1 %1241 }
 0x1a7   : > { %v1243_v14 = vrot.slane %v1242_v15, 1  ;;  %v1232_v16 = vpop.permute.xlu0 %1231 }
 0x1a8   : > { %v1233_v44 = vrot.slane %v1232_v16, 1 }
 0x1a9   : > { %v1244_v17 = vsel %vm1103_vm5, %v1242_v15, %v1243_v14 }
 0x1aa   : > { %v1246_v18 = vadd.f32 %v1244_v17, %v1206_v1  ;;  %v1343_v22 = vpop.permute.xlu2 %1342  ;;  %v1234_v45 = vsel %vm1103_vm5, %v1232_v16, %v1233_v44 }
 0x1ab   : > { %v1236_v51 = vadd.f32 %v1234_v45, %v1196_v54  ;;  %v1344_v54 = vrot.slane %v1343_v22, 1  ;;  %v1582_v45 = vlaneseq }
 0x1ac   : > { %v3045_v23 = vadd.f32 %v1285_v21, %v1246_v18 }
 0x1ad   : > { %v1345_v12 = vsel %vm1264_vm6, %v1343_v22, %v1344_v54  ;;  %vm3115_vm8 = vcmp.lt.s32.totalorder %v1582_v45, 256 }
 0x1ae   : > { %v1273_v25 = vpop.permute.xlu1 %1272 }
 0x1af   : > { %v1262_v26 = vpop.permute.xlu0 %1261  ;;  %v1274_v43 = vrot.slane %v1273_v25, 1 }
 0x1b0   : > { %v1263_v49 = vrot.slane %v1262_v26, 1 }
 0x1b1   : > { %v1275_v19 = vsel %vm1264_vm6, %v1273_v25, %v1274_v43 }
 0x1b2   : > { %v1373_v28 = vpop.permute.xlu2 %1372  ;;  %v1277_v53 = vadd.f32 %v1275_v19, %v1236_v51  ;;  %v1265_v56 = vsel %vm1264_vm6, %v1262_v26, %v1263_v49 }
 0x1b3   : > { %v1267_v35 = vadd.f32 %v1265_v56, %v3036_v63  ;;  %v1374_v3 = vrot.slane %v1373_v28, 1 }
 0x1b4   : > { %v1317_v59 = vadd.f32 %v1315_v0, %v1277_v53 }
 0x1b5   : > { %v1375_v14 = vsel %vm1264_vm6, %v1373_v28, %v1374_v3 }
 0x1b6   : > { %v1303_v30 = vpop.permute.xlu1 %1302 }
 0x1b7   : > { %v1293_v29 = vpop.permute.xlu0 %1292  ;;  %v1304_v40 = vrot.slane %v1303_v30, 1 }
 0x1b8   : > { %v1294_v58 = vrot.slane %v1293_v29, 1 }
 0x1b9   : > { %v1305_v62 = vsel %vm1264_vm6, %v1303_v30, %v1304_v40 }
 0x1ba   : > { %v3047_v20 = vpop.permute.xlu2 %1402  ;;  %v1307_v7 = vadd.f32 %v1305_v62, %v1267_v35  ;;  %v1295_v10 = vsel %vm1264_vm6, %v1293_v29, %v1294_v58 }
 0x1bb   : > { %v1297_v16 = vadd.f32 %v1295_v10, %v3041_v13  ;;  %v1404_v26 = vrot.slane %v3047_v20, 1  ;;  %v1580_v10 = vstv %s3099_s25 }
 0x1bc   : > { %v1347_v25 = vadd.f32 %v1345_v12, %v1307_v7 }
 0x1bd   : > { %v1405_v56 = vsel %vm1264_vm6, %v3047_v20, %v1404_v26 }
 0x1be   : > { %v3049_v31 = vpop.permute.xlu1 %1332 }
 0x1bf   : > { %v3051_v33 = vpop.permute.xlu0 %1322  ;;  %v1334_v1 = vrot.slane %v3049_v31, 1 }
 0x1c0   : > { %v1324_v63 = vrot.slane %v3051_v33, 1 }
 0x1c2   : > { %v1434_v46 = vpop.permute.xlu2 %1433 }
 0x1c3   : > { %v1435_v27 = vrot.slane %v1434_v46, 1 }
 0x1c5   : > { %v1436_v5 = vsel %vm1425_vm7, %v1434_v46, %v1435_v27  ;;  %v1335_v46 = vsel %vm1264_vm6, %v3049_v31, %v1334_v1 }
 0x1c6   : > { %v3053_v34 = vpop.permute.xlu1 %1362 }
 0x1c7   : > { %v1353_v38 = vpop.permute.xlu0 %1352  ;;  %v1364_v22 = vrot.slane %v3053_v34, 1 }
 0x1c8   : > { %v1354_v52 = vrot.slane %v1353_v38, 1 }
 0x1c9   : > { %v1365_v49 = vsel %vm1264_vm6, %v3053_v34, %v1364_v22 }
 0x1ca   : > { %v3055_v37 = vpop.permute.xlu2 %1463  ;;  %v1355_v57 = vsel %vm1264_vm6, %v1353_v38, %v1354_v52 }
 0x1cb   : > { %v1357_v2 = vadd.f32 %v1355_v57, %v1317_v59  ;;  %v1465_v28 = vrot.slane %v3055_v37, 1 }
 0x1cd   : > { %v1466_v0 = vsel %vm1425_vm7, %v3055_v37, %v1465_v28 }
 0x1ce   : > { %v1393_v36 = vpop.permute.xlu1 %1392 }
 0x1cf   : > { %v1383_v61 = vpop.permute.xlu0 %1382  ;;  %v1394_v55 = vrot.slane %v1393_v36, 1 }
 0x1d0   : > { %v1384_v4 = vrot.slane %v1383_v61, 1 }
 0x1d1   : > { %v1395_v24 = vsel %vm1264_vm6, %v1393_v36, %v1394_v55  ;;  %v1588_v55 = vstv %s3081_s29 }
 0x1d2   : > { %v3057_v42 = vpop.permute.xlu2 %1493  ;;  %v1397_v11 = vadd.f32 %v1395_v24, %v1357_v2  ;;  %v1385_v17 = vsel %vm1264_vm6, %v1383_v61, %v1384_v4  ;;  %v1325_v61 = vsel %vm1264_vm6, %v3051_v33, %v1324_v63 }
 0x1d3   : > { %v1387_v44 = vadd.f32 %v1385_v17, %v1347_v25  ;;  %v1327_v33 = vadd.f32 %v1325_v61, %v3045_v23  ;;  %v1495_v35 = vrot.slane %v3057_v42, 1 }
 0x1d4   : > { %v1438_v30 = vadd.f32 %v1436_v5, %v1397_v11 }
 0x1d5   : > { %v1367_v58 = vadd.f32 %v1365_v49, %v1327_v33 }
 0x1d6   : > { %v1423_v39 = vpop.permute.xlu1 %1422 }
 0x1d7   : > { %v3059_v41 = vpop.permute.xlu0 %1412  ;;  %v1424_v15 = vrot.slane %v1423_v39, 1  ;;  %v1407_v7 = vadd.f32 %v1405_v56, %v1367_v58 }
 0x1d8   : > { %v1414_v19 = vrot.slane %v3059_v41, 1 }
 0x1d9   : > { %v1426_v38 = vsel %vm1425_vm7, %v1423_v39, %v1424_v15  ;;  %v1337_v39 = vadd.f32 %v1335_v46, %v1297_v16  ;;  %v1496_v15 = vsel %vm1425_vm7, %v3057_v42, %v1495_v35  ;;  %v1593_v46 = vstv %s1874_s17 }
 0x1da   : > { %v3067_v9 = vpop.permute.xlu2 %1523  ;;  %v1428_v52 = vadd.f32 %v1426_v38, %v1387_v44  ;;  %v1415_v34 = vsel %vm1264_vm6, %v3059_v41, %v1414_v19 }
 0x1db   : > { %v1377_v37 = vadd.f32 %v1375_v14, %v1337_v39 }
 0x1dc   : > { %v1468_v54 = vadd.f32 %v1466_v0, %v1428_v52 }
 0x1dd   : > { %v1417_v2 = vadd.f32 %v1415_v34, %v1377_v37 }
 0x1de   : > { %v3062_v47 = vpop.permute.xlu1 %1453 }
 0x1df   : > { %v3065_v50 = vpop.permute.xlu0 %1443  ;;  %v1455_v40 = vrot.slane %v3062_v47, 1 }
 0x1e0   : > { %v1445_v57 = vrot.slane %v3065_v50, 1 }
 0x1e2   : > { %v1554_v8 = vpop.permute.xlu2 %1553  ;;  %v1446_v4 = vsel %vm1425_vm7, %v3065_v50, %v1445_v57  ;;  %v1525_v50 = vrot.slane %v3067_v9, 1 }
 0x1e3   : > { %v1555_v18 = vrot.slane %v1554_v8, 1  ;;  %v1448_v5 = vadd.f32 %v1446_v4, %v1407_v7 }
 0x1e5   : > { %v1556_v31 = vsel %vm1425_vm7, %v1554_v8, %v1555_v18 }
 0x1e6   : > { %v3072_v60 = vpop.permute.xlu1 %1483 }
 0x1e7   : > { %v1474_v32 = vpop.permute.xlu0 %1473  ;;  %v1485_v24 = vrot.slane %v3072_v60, 1 }
 0x1e8   : > { %v1475_v6 = vrot.slane %v1474_v32, 1 }
 0x1e9   : > { %v1486_v12 = vsel %vm1425_vm7, %v3072_v60, %v1485_v24 }
 0x1ea   : > { %v1476_v21 = vsel %vm1425_vm7, %v1474_v32, %v1475_v6  ;;  %v1456_v32 = vsel %vm1425_vm7, %v3062_v47, %v1455_v40  ;;  %v1488_v14 = vadd.f32 %v1486_v12, %v1448_v5 }
 0x1eb   : > { %v1478_v43 = vadd.f32 %v1476_v21, %v1438_v30  ;;  %v1458_v8 = vadd.f32 %v1456_v32, %v1417_v2  ;;  %v1526_v21 = vsel %vm1425_vm7, %v3067_v9, %v1525_v50  ;;  %v1598_v30 = vstv %s1876_s8 }
 0x1ec   : > { %v1528_v26 = vadd.f32 %v1526_v21, %v1488_v14 }
 0x1ed   : > { %v1498_v17 = vadd.f32 %v1496_v15, %v1458_v8 }
 0x1ee   : > { %v1514_v29 = vpop.permute.xlu1 %1513 }
 0x1ef   : > { %v1515_v13 = vrot.slane %v1514_v29, 1  ;;  %v1504_v36 = vpop.permute.xlu0 %1503 }
 0x1f0   : > { %v1505_v51 = vrot.slane %v1504_v36, 1 }
 0x1f1   : > { %v1516_v48 = vsel %vm1425_vm7, %v1514_v29, %v1515_v13 }
 0x1f2   : > { %v1518_v53 = vadd.f32 %v1516_v48, %v1478_v43  ;;  %v1506_v62 = vsel %vm1425_vm7, %v1504_v36, %v1505_v51 }
 0x1f3   : > { %v1508_v6 = vadd.f32 %v1506_v62, %v1468_v54 }
 0x1f4   : > { %v1558_v59 = vadd.f32 %v1556_v31, %v1518_v53 }
 0x1f6   : > { %v1589_v27 = vadd.f32 %v1588_v55, %v1558_v59  ;;  %v1544_v20 = vpop.permute.xlu1 %1543 }
 0x1f7   : > { %v1545_v3 = vrot.slane %v1544_v20, 1  ;;  %v1534_v41 = vpop.permute.xlu0 %1533 }
 0x1f8   : > { %1873 = vst.msk [vmem:[%s3125_s4 + $0x1] ss:$4 sm:$0x3] %vm3115_vm8, %v1589_v27  ;;  %v1535_v11 = vrot.slane %v1534_v41, 1 }
 0x1f9   : > { %v1546_v47 = vsel %vm1425_vm7, %v1544_v20, %v1545_v3 }
 0x1fa   : > { %v1548_v1 = vadd.f32 %v1546_v47, %v1508_v6  ;;  %v1536_v16 = vsel %vm1425_vm7, %v1534_v41, %v1535_v11 }
 0x1fb   : > { %v1538_v42 = vadd.f32 %v1536_v16, %v1498_v17 }
 0x1fc   : > { %v1581_v63 = vadd.f32 %v1580_v10, %v1548_v1 }
 0x1fe   : > { %1586 = vst.msk [vmem:[%s3125_s4] ss:$4 sm:$0x3] %vm3115_vm8, %v1581_v63  ;;  %v1574_v60 = vpop.permute.xlu1 %1573 }
 0x1ff   : > { %v1575_v18 = vrot.slane %v1574_v60, 1  ;;  %v1564_v25 = vpop.permute.xlu0 %1563 }
 0x200   : > { %v1565_v22 = vrot.slane %v1564_v25, 1 }
 0x201   : > { %v1576_v29 = vsel %vm1425_vm7, %v1574_v60, %v1575_v18 }
 0x202   : > { %v1578_v9 = vadd.f32 %v1576_v29, %v1538_v42  ;;  %v1566_v38 = vsel %vm1425_vm7, %v1564_v25, %v1565_v22 }
 0x203   : > { %v1568_v28 = vadd.f32 %v1566_v38, %v1528_v26 }
 0x204   : > { %v1599_v13 = vadd.f32 %v1598_v30, %v1578_v9 }
 0x205   : > { %v1594_v36 = vadd.f32 %v1593_v46, %v1568_v28 }
 0x206   : > { %1877 = vst.msk [vmem:[%s3125_s4 + $0x3] ss:$4 sm:$0x3] %vm3115_vm8, %v1599_v13 }
 0x207   : > { %1875 = vst.msk [vmem:[%s3125_s4 + $0x2] ss:$4 sm:$0x3] %vm3115_vm8, %v1594_v36 }
 0x208   : > { %2053 = shalt.err (!%p2050_p11)
}
 0x209   : > { %1897 = dma.vmem_to_hbm [thread:$0]  (%p2201_p5), %s1617_s16, 128, %s1619_s26, %s1603_s9  }
 0x20a PF: > { %s1630_s7 = sand.u32 1, %s2088_s12   ;;  %p3196_p12 = scmp.ge.s32.totalorder %s2100_s15, 2 }
 0x20b   : > { %s1631_s20 = scalar_lea.sflag [#allocation4], %s1630_s7 }
 0x20c   : > { %p1911_p13 = pnand %p3196_p12, %p2167_p6 }
 0x20e   : > { %p1912_p0 = pneg %p1911_p13 }
 0x210   : > { %2083 = dma.done.wait (%p1912_p0), %s1631_s20, 128  }
 0x211   : > { %2085 = vsyncadd (%p1912_p0), %s1631_s20, 4294967168  ;;  %p18_p3 = scmp.ge.s32.totalorder %s2188_s27, 4   ;;  %s3197_s12 = smov %s2092_s13 }
 0x212   : > { %s3198_s13 = smov %s2096_s14  ;;  %s3199_s14 = smov %s2197_s5 }
 0x213   : > { %s3200_s15 = smov %s2188_s27  ;;  %20 = sbr.rel (!%p18_p3) target bundleno = 7 (0x7), region = 93 }
 0x218   :  { %1637 = vsyncpa [#allocation3], 1 }
 0x219   :  { %1639 = vsyncpa [#allocation3 + $0x1], 1 }
 0x21a   :  { %1640 = vsyncpa [#allocation4], 1 }
 0x21b   :  { %1642 = vsyncpa [#allocation4 + $0x1], 1 }
 0x21c   :  { %1643 = vsyncpa [#allocation5], 1 }
 0x21d   :  { %1645 = vsyncpa [#allocation5 + $0x1], 1 }
 0x21e   :  { %1646 = vsyncpa [#allocation6], 1 }
 0x21f   :  { %1648 = vsyncpa [#allocation6 + $0x1], 1 }

</bundles_post_ra>
